<compile_context>
chip_gen: v7x
topology: tpu7x:2x2x1
jax: 0.10.0
libtpu: 0.0.40
codegen_flags: <defaults>
</compile_context>

<pallas_src>
import jax
import jax.numpy as jnp
from jax.experimental import pallas as pl
from jax.experimental.pallas import tpu as pltpu

# ---- synthetic env params (deterministic, small) ----
ENV_PARAMS = dict(obs=10, goal=5, action=4, action_max=2.0)
HIDDEN = 256
MAX_TILE_B = 1024   # cap per-step rows; multiple of 256 (v6e/v7x MXU) and 128 (v5e)


def _round_up(n, m):
    return ((n + m - 1) // m) * m


def _pick_tile_b(batch):
    """Batch tile: at least 2 tiles whenever possible (v7x megacore), <= 1024 rows."""
    b8 = _round_up(batch, 8)
    if b8 < 16:
        return b8                                   # single tiny tile
    return min(MAX_TILE_B, _round_up(b8, 16) // 2)  # split into >= 2 tiles


def _critic_kernel(x_ref, a_ref, w1x_ref, w1a_ref, b1_ref, w2_ref, b2_ref,
                   w3_ref, b3_ref, wq_ref, bq_ref, o_ref):
    """One batch tile of the critic forward pass, fully VMEM-resident.

    x_ref: [TB, obs+goal] f32     a_ref: [TB, action] f32
    w1x:   [obs+goal, 256] bf16   w1a: [action, 256] bf16 (1/max_action folded in)
    w2,w3: [256, 256] bf16        b1,b2,b3: [1, 256] f32
    wq:    [1, 256] f32 (q_out weight, transposed)   bq: [1, 1] f32
    o_ref: [TB, 1] f32
    """
    # fc1: concat split into two MXU dots; action scaling already folded into w1a.
    h = jnp.dot(x_ref[...].astype(jnp.bfloat16), w1x_ref[...],
                preferred_element_type=jnp.float32)
    h = h + jnp.dot(a_ref[...].astype(jnp.bfloat16), w1a_ref[...],
                    preferred_element_type=jnp.float32)
    h = jnp.maximum(h + b1_ref[...], 0.0)

    # fc2 (bf16 operands, f32 accumulation; relu/bias in f32)
    h = jnp.dot(h.astype(jnp.bfloat16), w2_ref[...],
                preferred_element_type=jnp.float32)
    h = jnp.maximum(h + b2_ref[...], 0.0)

    # fc3
    h = jnp.dot(h.astype(jnp.bfloat16), w3_ref[...],
                preferred_element_type=jnp.float32)
    h = jnp.maximum(h + b3_ref[...], 0.0)

    # q_out: an N=1 matmul wastes a full MXU push -> VPU multiply + lane reduce.
    q = jnp.sum(h * wq_ref[...], axis=-1, keepdims=True) + bq_ref[...]
    o_ref[...] = q.astype(o_ref.dtype)


def critic_forward(x, actions, kernel_params):
    """x: [B, obs+goal] f32, actions: [B, action] f32 -> q: [B, 1] f32."""
    (w1x, w1a, b1, w2, b2, w3, b3, wq_row, bq) = kernel_params
    batch = x.shape[0]
    d_xg = x.shape[1]
    d_a = actions.shape[1]

    tb = _pick_tile_b(batch)
    b_pad = _round_up(batch, tb)
    num_tiles = b_pad // tb

    # Only pad the batch rows (no feature concat/pad copy); no-op when aligned.
    if b_pad != batch:
        x = jnp.pad(x, ((0, b_pad - batch), (0, 0)))
        actions = jnp.pad(actions, ((0, b_pad - batch), (0, 0)))

    h = HIDDEN
    flops = 2 * b_pad * ((d_xg + d_a) * h + 2 * h * h + h)
    param_bytes = sum(int(p.size) * p.dtype.itemsize for p in kernel_params)
    bytes_accessed = (x.size + actions.size + b_pad) * 4 + param_bytes

    q_pad = pl.pallas_call(
        _critic_kernel,
        out_shape=jax.ShapeDtypeStruct((b_pad, 1), jnp.float32),
        grid=(num_tiles,),
        in_specs=[
            # Activations: one batch tile per grid step (pipelined DMA).
            pl.BlockSpec((tb, d_xg), lambda i: (i, 0)),
            pl.BlockSpec((tb, d_a), lambda i: (i, 0)),
            # Weights / biases: constant block index -> loaded once, VMEM-resident.
            pl.BlockSpec(w1x.shape, lambda i: (0, 0)),
            pl.BlockSpec(w1a.shape, lambda i: (0, 0)),
            pl.BlockSpec(b1.shape, lambda i: (0, 0)),
            pl.BlockSpec(w2.shape, lambda i: (0, 0)),
            pl.BlockSpec(b2.shape, lambda i: (0, 0)),
            pl.BlockSpec(w3.shape, lambda i: (0, 0)),
            pl.BlockSpec(b3.shape, lambda i: (0, 0)),
            pl.BlockSpec(wq_row.shape, lambda i: (0, 0)),
            pl.BlockSpec(bq.shape, lambda i: (0, 0)),
        ],
        out_specs=pl.BlockSpec((tb, 1), lambda i: (i, 0)),
        compiler_params=pltpu.CompilerParams(
            dimension_semantics=("parallel",)),
        cost_estimate=pl.CostEstimate(
            flops=flops, transcendentals=0, bytes_accessed=bytes_accessed),
    )(x, actions, w1x, w1a, b1, w2, b2, w3, b3, wq_row, bq)

    return q_pad[:batch]


def init_params(key, env_params):
    """Raw parameters matching the PyTorch module (stored transposed [in, out])."""
    d_in = env_params['obs'] + env_params['goal'] + env_params['action']
    keys = jax.random.split(key, 8)

    def lin(kw, kb, fan_in, fan_out):
        bound = 1.0 / float(fan_in) ** 0.5
        w = jax.random.uniform(kw, (fan_in, fan_out), jnp.float32, -bound, bound)
        b = jax.random.uniform(kb, (1, fan_out), jnp.float32, -bound, bound)
        return w, b

    w1, b1 = lin(keys[0], keys[1], d_in, HIDDEN)     # fc1
    w2, b2 = lin(keys[2], keys[3], HIDDEN, HIDDEN)   # fc2
    w3, b3 = lin(keys[4], keys[5], HIDDEN, HIDDEN)   # fc3
    wq, bq = lin(keys[6], keys[7], HIDDEN, 1)        # q_out
    return dict(w1=w1, b1=b1, w2=w2, b2=b2, w3=w3, b3=b3, wq=wq, bq=bq)


def pack_params(raw, env_params):
    """Kernel layout: split fc1's weight into (obs+goal) and action blocks, fold
    1/max_action into the action block (in f32, then cast), store the big
    matrices in bf16, transpose q_out's weight to a [1, 256] row."""
    obs_goal = env_params['obs'] + env_params['goal']
    w1 = raw['w1']
    w1x = w1[:obs_goal].astype(jnp.bfloat16)
    w1a = (w1[obs_goal:] * (1.0 / env_params['action_max'])).astype(jnp.bfloat16)
    return (w1x, w1a, raw['b1'],
            raw['w2'].astype(jnp.bfloat16), raw['b2'],
            raw['w3'].astype(jnp.bfloat16), raw['b3'],
            raw['wq'].T, raw['bq'])


def critic_reference_f32(x, actions, raw, env_params):
    """Pure-JAX f32 reference mirroring the PyTorch forward."""
    xa = jnp.concatenate([x, actions / env_params['action_max']], axis=1)
    h = jax.nn.relu(xa @ raw['w1'] + raw['b1'])
    h = jax.nn.relu(h @ raw['w2'] + raw['b2'])
    h = jax.nn.relu(h @ raw['w3'] + raw['b3'])
    return h @ raw['wq'] + raw['bq']


def critic_reference_mixed(x, actions, kernel_params):
    """Reference with the same mixed precision as the kernel (bf16 dots, f32 acc)."""
    (w1x, w1a, b1, w2, b2, w3, b3, wq_row, bq) = kernel_params

    def bdot(a, b):
        return jnp.dot(a.astype(jnp.bfloat16), b, preferred_element_type=jnp.float32)

    h = jnp.maximum(bdot(x, w1x) + bdot(actions, w1a) + b1, 0.0)
    h = jnp.maximum(bdot(h, w2) + b2, 0.0)
    h = jnp.maximum(bdot(h, w3) + b3, 0.0)
    return jnp.sum(h * wq_row, axis=-1, keepdims=True) + bq


if __name__ == "__main__":
    key = jax.random.PRNGKey(0)
    k_x, k_a, k_p = jax.random.split(key, 3)

    # Small demo shape; B=260 -> two 136-row tiles (grid of 2 parallel steps,
    # second tile partially zero-padded and sliced off afterwards).
    B = 260
    obs_goal = ENV_PARAMS['obs'] + ENV_PARAMS['goal']
    x = jax.random.normal(k_x, (B, obs_goal), jnp.float32)
    actions = jax.random.uniform(
        k_a, (B, ENV_PARAMS['action']), jnp.float32,
        -ENV_PARAMS['action_max'], ENV_PARAMS['action_max'])

    raw_params = init_params(k_p, ENV_PARAMS)
    kernel_params = pack_params(raw_params, ENV_PARAMS)

    q = critic_forward(x, actions, kernel_params)
    q = jax.block_until_ready(q)
    assert q.shape == (B, 1)

    # Tight check against a matching mixed-precision (bf16 weights) reference.
    q_ref_mixed = critic_reference_mixed(x, actions, kernel_params)
    assert jnp.allclose(q, q_ref_mixed, atol=2e-3, rtol=2e-3), \
        float(jnp.max(jnp.abs(q - q_ref_mixed)))

    # Loose sanity check against the f32 PyTorch-equivalent forward (bf16 weights
    # introduce ~1% relative error, well inside this tolerance).
    q_ref_f32 = critic_reference_f32(x, actions, raw_params, ENV_PARAMS)
    assert jnp.allclose(q, q_ref_f32, atol=5e-2, rtol=5e-2), \
        float(jnp.max(jnp.abs(q - q_ref_f32)))

    print("KERNEL_OK")
</pallas_src>

<mosaic_0001>
module attributes {stable_mosaic.version = 11 : i64} {
  func.func @_critic_kernel(%arg0: i32, %arg1: memref<136x15xf32, #tpu.memory_space<vmem>>, %arg2: memref<136x4xf32, #tpu.memory_space<vmem>>, %arg3: memref<15x256xbf16, #tpu.memory_space<vmem>>, %arg4: memref<4x256xbf16, #tpu.memory_space<vmem>>, %arg5: memref<1x256xf32, #tpu.memory_space<vmem>>, %arg6: memref<256x256xbf16, #tpu.memory_space<vmem>>, %arg7: memref<1x256xf32, #tpu.memory_space<vmem>>, %arg8: memref<256x256xbf16, #tpu.memory_space<vmem>>, %arg9: memref<1x256xf32, #tpu.memory_space<vmem>>, %arg10: memref<1x256xf32, #tpu.memory_space<vmem>>, %arg11: memref<1x1xf32, #tpu.memory_space<vmem>>, %arg12: memref<136x1xf32, #tpu.memory_space<vmem>>) attributes {dimension_semantics = [#tpu.dimension_semantics<parallel>], iteration_bounds = array<i64: 2>, scalar_prefetch = 0 : i64, scratch_operands = 0 : i64, tpu.core_type = #tpu.core_type<tc>, window_params = [{transform_indices = @transform_0, window_bounds = array<i64: 136, 15>}, {transform_indices = @transform_1, window_bounds = array<i64: 136, 4>}, {pipeline_mode = #tpu.pipeline_mode<synchronous>, transform_indices = @transform_2, window_bounds = array<i64: 15, 256>}, {pipeline_mode = #tpu.pipeline_mode<synchronous>, transform_indices = @transform_3, window_bounds = array<i64: 4, 256>}, {pipeline_mode = #tpu.pipeline_mode<synchronous>, transform_indices = @transform_4, window_bounds = array<i64: 1, 256>}, {pipeline_mode = #tpu.pipeline_mode<synchronous>, transform_indices = @transform_5, window_bounds = array<i64: 256, 256>}, {pipeline_mode = #tpu.pipeline_mode<synchronous>, transform_indices = @transform_6, window_bounds = array<i64: 1, 256>}, {pipeline_mode = #tpu.pipeline_mode<synchronous>, transform_indices = @transform_7, window_bounds = array<i64: 256, 256>}, {pipeline_mode = #tpu.pipeline_mode<synchronous>, transform_indices = @transform_8, window_bounds = array<i64: 1, 256>}, {pipeline_mode = #tpu.pipeline_mode<synchronous>, transform_indices = @transform_9, window_bounds = array<i64: 1, 256>}, {pipeline_mode = #tpu.pipeline_mode<synchronous>, transform_indices = @transform_10, window_bounds = array<i64: 1, 1>}, {transform_indices = @transform_11, window_bounds = array<i64: 136, 1>}]} {
    %c0 = arith.constant 0 : index
    %c0_0 = arith.constant 0 : index
    %0 = vector.load %arg1[%c0, %c0_0] : memref<136x15xf32, #tpu.memory_space<vmem>>, vector<136x15xf32>
    %1 = arith.truncf %0 : vector<136x15xf32> to vector<136x15xbf16>
    %c0_1 = arith.constant 0 : index
    %c0_2 = arith.constant 0 : index
    %2 = vector.load %arg3[%c0_1, %c0_2] : memref<15x256xbf16, #tpu.memory_space<vmem>>, vector<15x256xbf16>
    %cst = arith.constant dense<0.000000e+00> : vector<136x256xf32>
    %3 = tpu.matmul %1, %2, %cst {dimension_numbers = #tpu.dot_dimension_numbers<[1], [0], [0], [1], [0, 0, 1, 1], [], []>} : vector<136x15xbf16>, vector<15x256xbf16>, vector<136x256xf32> -> vector<136x256xf32>
    %c0_3 = arith.constant 0 : index
    %c0_4 = arith.constant 0 : index
    %4 = vector.load %arg2[%c0_3, %c0_4] : memref<136x4xf32, #tpu.memory_space<vmem>>, vector<136x4xf32>
    %5 = arith.truncf %4 : vector<136x4xf32> to vector<136x4xbf16>
    %c0_5 = arith.constant 0 : index
    %c0_6 = arith.constant 0 : index
    %6 = vector.load %arg4[%c0_5, %c0_6] : memref<4x256xbf16, #tpu.memory_space<vmem>>, vector<4x256xbf16>
    %cst_7 = arith.constant dense<0.000000e+00> : vector<136x256xf32>
    %7 = tpu.matmul %5, %6, %cst_7 {dimension_numbers = #tpu.dot_dimension_numbers<[1], [0], [0], [1], [0, 0, 1, 1], [], []>} : vector<136x4xbf16>, vector<4x256xbf16>, vector<136x256xf32> -> vector<136x256xf32>
    %8 = arith.addf %3, %7 : vector<136x256xf32>
    %c0_8 = arith.constant 0 : index
    %c0_9 = arith.constant 0 : index
    %9 = vector.load %arg5[%c0_8, %c0_9] : memref<1x256xf32, #tpu.memory_space<vmem>>, vector<1x256xf32>
    %10 = vector.broadcast %9 : vector<1x256xf32> to vector<136x256xf32>
    %11 = arith.addf %8, %10 : vector<136x256xf32>
    %cst_10 = arith.constant 0.000000e+00 : f32
    %12 = vector.broadcast %cst_10 : f32 to vector<136x256xf32>
    %13 = arith.maximumf %11, %12 : vector<136x256xf32>
    %14 = arith.truncf %13 : vector<136x256xf32> to vector<136x256xbf16>
    %c0_11 = arith.constant 0 : index
    %c0_12 = arith.constant 0 : index
    %15 = vector.load %arg6[%c0_11, %c0_12] : memref<256x256xbf16, #tpu.memory_space<vmem>>, vector<256x256xbf16>
    %cst_13 = arith.constant dense<0.000000e+00> : vector<136x256xf32>
    %16 = tpu.matmul %14, %15, %cst_13 {dimension_numbers = #tpu.dot_dimension_numbers<[1], [0], [0], [1], [0, 0, 1, 1], [], []>} : vector<136x256xbf16>, vector<256x256xbf16>, vector<136x256xf32> -> vector<136x256xf32>
    %c0_14 = arith.constant 0 : index
    %c0_15 = arith.constant 0 : index
    %17 = vector.load %arg7[%c0_14, %c0_15] : memref<1x256xf32, #tpu.memory_space<vmem>>, vector<1x256xf32>
    %18 = vector.broadcast %17 : vector<1x256xf32> to vector<136x256xf32>
    %19 = arith.addf %16, %18 : vector<136x256xf32>
    %cst_16 = arith.constant 0.000000e+00 : f32
    %20 = vector.broadcast %cst_16 : f32 to vector<136x256xf32>
    %21 = arith.maximumf %19, %20 : vector<136x256xf32>
    %22 = arith.truncf %21 : vector<136x256xf32> to vector<136x256xbf16>
    %c0_17 = arith.constant 0 : index
    %c0_18 = arith.constant 0 : index
    %23 = vector.load %arg8[%c0_17, %c0_18] : memref<256x256xbf16, #tpu.memory_space<vmem>>, vector<256x256xbf16>
    %cst_19 = arith.constant dense<0.000000e+00> : vector<136x256xf32>
    %24 = tpu.matmul %22, %23, %cst_19 {dimension_numbers = #tpu.dot_dimension_numbers<[1], [0], [0], [1], [0, 0, 1, 1], [], []>} : vector<136x256xbf16>, vector<256x256xbf16>, vector<136x256xf32> -> vector<136x256xf32>
    %c0_20 = arith.constant 0 : index
    %c0_21 = arith.constant 0 : index
    %25 = vector.load %arg9[%c0_20, %c0_21] : memref<1x256xf32, #tpu.memory_space<vmem>>, vector<1x256xf32>
    %26 = vector.broadcast %25 : vector<1x256xf32> to vector<136x256xf32>
    %27 = arith.addf %24, %26 : vector<136x256xf32>
    %cst_22 = arith.constant 0.000000e+00 : f32
    %28 = vector.broadcast %cst_22 : f32 to vector<136x256xf32>
    %29 = arith.maximumf %27, %28 : vector<136x256xf32>
    %c0_23 = arith.constant 0 : index
    %c0_24 = arith.constant 0 : index
    %30 = vector.load %arg10[%c0_23, %c0_24] : memref<1x256xf32, #tpu.memory_space<vmem>>, vector<1x256xf32>
    %31 = vector.broadcast %30 : vector<1x256xf32> to vector<136x256xf32>
    %32 = arith.mulf %29, %31 : vector<136x256xf32>
    %cst_25 = arith.constant dense<0.000000e+00> : vector<136xf32>
    %33 = vector.multi_reduction <add>, %32, %cst_25 [1] : vector<136x256xf32> to vector<136xf32>
    %34 = vector.shape_cast %33 : vector<136xf32> to vector<136x1xf32>
    %c0_26 = arith.constant 0 : index
    %c0_27 = arith.constant 0 : index
    %35 = vector.load %arg11[%c0_26, %c0_27] : memref<1x1xf32, #tpu.memory_space<vmem>>, vector<1x1xf32>
    %36 = vector.broadcast %35 : vector<1x1xf32> to vector<136x1xf32>
    %37 = arith.addf %34, %36 : vector<136x1xf32>
    %c0_28 = arith.constant 0 : index
    %c0_29 = arith.constant 0 : index
    %38 = vector.load %arg12[%c0_28, %c0_29] : memref<136x1xf32, #tpu.memory_space<vmem>>, vector<136x1xf32>
    tpu.vector_store %arg12[%c0_28, %c0_29], %37 {strides = array<i32>} : memref<136x1xf32, #tpu.memory_space<vmem>>, vector<136x1xf32>,
    return
  }
  func.func @transform_0(%arg0: i32) -> (i32, i32) {
    %c0_i32 = arith.constant 0 : i32
    %c0_i32_0 = arith.constant 0 : i32
    return %arg0, %c0_i32 : i32, i32
  }
  func.func @transform_1(%arg0: i32) -> (i32, i32) {
    %c0_i32 = arith.constant 0 : i32
    %c0_i32_0 = arith.constant 0 : i32
    return %arg0, %c0_i32 : i32, i32
  }
  func.func @transform_2(%arg0: i32) -> (i32, i32) {
    %c0_i32 = arith.constant 0 : i32
    %c0_i32_0 = arith.constant 0 : i32
    %c0_i32_1 = arith.constant 0 : i32
    return %c0_i32, %c0_i32_0 : i32, i32
  }
  func.func @transform_3(%arg0: i32) -> (i32, i32) {
    %c0_i32 = arith.constant 0 : i32
    %c0_i32_0 = arith.constant 0 : i32
    %c0_i32_1 = arith.constant 0 : i32
    return %c0_i32, %c0_i32_0 : i32, i32
  }
  func.func @transform_4(%arg0: i32) -> (i32, i32) {
    %c0_i32 = arith.constant 0 : i32
    %c0_i32_0 = arith.constant 0 : i32
    %c0_i32_1 = arith.constant 0 : i32
    return %c0_i32, %c0_i32_0 : i32, i32
  }
  func.func @transform_5(%arg0: i32) -> (i32, i32) {
    %c0_i32 = arith.constant 0 : i32
    %c0_i32_0 = arith.constant 0 : i32
    %c0_i32_1 = arith.constant 0 : i32
    return %c0_i32, %c0_i32_0 : i32, i32
  }
  func.func @transform_6(%arg0: i32) -> (i32, i32) {
    %c0_i32 = arith.constant 0 : i32
    %c0_i32_0 = arith.constant 0 : i32
    %c0_i32_1 = arith.constant 0 : i32
    return %c0_i32, %c0_i32_0 : i32, i32
  }
  func.func @transform_7(%arg0: i32) -> (i32, i32) {
    %c0_i32 = arith.constant 0 : i32
    %c0_i32_0 = arith.constant 0 : i32
    %c0_i32_1 = arith.constant 0 : i32
    return %c0_i32, %c0_i32_0 : i32, i32
  }
  func.func @transform_8(%arg0: i32) -> (i32, i32) {
    %c0_i32 = arith.constant 0 : i32
    %c0_i32_0 = arith.constant 0 : i32
    %c0_i32_1 = arith.constant 0 : i32
    return %c0_i32, %c0_i32_0 : i32, i32
  }
  func.func @transform_9(%arg0: i32) -> (i32, i32) {
    %c0_i32 = arith.constant 0 : i32
    %c0_i32_0 = arith.constant 0 : i32
    %c0_i32_1 = arith.constant 0 : i32
    return %c0_i32, %c0_i32_0 : i32, i32
  }
  func.func @transform_10(%arg0: i32) -> (i32, i32) {
    %c0_i32 = arith.constant 0 : i32
    %c0_i32_0 = arith.constant 0 : i32
    %c0_i32_1 = arith.constant 0 : i32
    return %c0_i32, %c0_i32_0 : i32, i32
  }
  func.func @transform_11(%arg0: i32) -> (i32, i32) {
    %c0_i32 = arith.constant 0 : i32
    %c0_i32_0 = arith.constant 0 : i32
    return %arg0, %c0_i32 : i32, i32
  }
}

</mosaic_0001>

<bundles_post_ra>
// kernel: tpu_custom_call.1
= control target key start
LH: loop header
LB: loop body
LE: loop exit
PB: predicated region body
PF: predicated region fallthrough
CT: control target
= control target key end

     0   :  { %s2186_s19 = smov 0   ;;  %s2812_s0 = inlined_call_operand.vmem [shape: f32[272,15], index: 0, kind: input, shape index: {}]   ;;  %s2813_s1 = inlined_call_operand.vmem [shape: f32[272,4], index: 1, kind: input, shape index: {}]   ;;  %s2814_s2 = inlined_call_operand.vmem [shape: bf16[15,256], index: 2, kind: input, shape index: {}]   ;;  %s2815_s3 = inlined_call_operand.vmem [shape: bf16[4,256], index: 3, kind: input, shape index: {}]   ;;  %s2816_s4 = inlined_call_operand.vmem [shape: f32[1,256], index: 4, kind: input, shape index: {}]   ;;  %s2817_s5 = inlined_call_operand.vmem [shape: bf16[256,256], index: 5, kind: input, shape index: {}]   ;;  %s2818_s6 = inlined_call_operand.vmem [shape: f32[1,256], index: 6, kind: input, shape index: {}]   ;;  %s2819_s7 = inlined_call_operand.vmem [shape: bf16[256,256], index: 7, kind: input, shape index: {}]   ;;  %s2820_s8 = inlined_call_operand.vmem [shape: f32[1,256], index: 8, kind: input, shape index: {}]   ;;  %s2821_s9 = inlined_call_operand.vmem [shape: f32[1,256], index: 9, kind: input, shape index: {}]   ;;  %s2822_s10 = inlined_call_operand.<no memory space> [shape: f32[1,1], index: 10, kind: input, shape index: {}]   ;;  %s2823_s11 = inlined_call_operand.vmem [shape: f32[272,1], index: 11, kind: output, shape index: {}]  }
   0x1   :  { %v16_v0 = vstv %s2822_s10 }
   0x2   :  { %17 = vst [vmem:[#allocation2] sm:$0x1] %v16_v0 }
   0x3 LB: > { %s1843_s20 = sadd.s32 4294967295, %s2119_s19   ;;  %p1847_p0 = scmp.ge.s32.totalorder %s2119_s19, 1  ;;  %s2119_s19 = sphi %s2186_s19, %s23_s19  }
   0x4   : > { %p351_p1 = scmp.lt.s32.totalorder %s2119_s19, 3 }
   0x6   : > { %p352_p2 = pnand %p1847_p0, %p351_p1 }
   0x7   : > { %v1851_v1 = vld.sshfl [vmem:[%s2815_s3] sm:$0x33 pattern:$0x76325410] (!%p352_p2)  ;;  %vm507_vm0 = vcmask (!%p352_p2), 1041408   ;;  %v2121_v4 = vmov (!%p352_p2), 0  }
   0x8   : > { %355 = sbr.rel (%p352_p2) target bundleno = 967 (0x3c7), region = 64  ;;  %v478_v2 = vcombine.high (!%p352_p2), %v1851_v1, %v1851_v1  ;;  %v509_v3 = vsel (!%p352_p2), %vm507_vm0, %v1851_v1, 0  ;;  %546 = vmatprep.mubr.bf16.mxu0 (!%p352_p2), %v2121_v4  ;;  %vm671_vm1 = vcmask (!%p352_p2), 1046528   ;;  %v2016_v5 = vld [vmem:[%s2814_s2 + $0x4] ss:$8 sps:$4 sm:$0xff] (!%p352_p2)   ;;  %vm672_vm2 = vcmask (!%p352_p2), 1047552  }
   0x9   : > { %s396_s24 = smul.u32 (!%p352_p2), 17, %s1843_s20  ;;  %v2122_v6 = vmov (!%p352_p2), 65535   ;;  %v2014_v8 = vld [vmem:[%s2814_s2] ss:$8 sps:$4 sm:$0xff] (!%p352_p2)   ;;  %vm479_vm3 = vcmask (!%p352_p2), 31744   ;;  %vm643_vm4 = vcmask (!%p352_p2), 121856  }
   0xa   : > { %1852 = vmatprep.subr.msk.bf16.mxu0 (!%p352_p2), %vm507_vm0, %v478_v2  ;;  %v673_v7 = vsel (!%p352_p2), %vm671_vm1, 4294967295, %v2122_v6  ;;  %v2017_v18 = vld [vmem:[%s2817_s5 + $0x4] ss:$8 sps:$4 sm:$0xff] (!%p352_p2)   ;;  %v2019_v19 = vld [vmem:[%s2817_s5] ss:$8 sps:$4 sm:$0xff] (!%p352_p2)   ;;  %vm1757_vm5 = vcmask (!%p352_p2), 7168  }
   0xb   : > { %515 = vmatpush1.bf16.msra.mxu0 (!%p352_p2), %v509_v3  ;;  %v674_v9 = vsel (!%p352_p2), %vm672_vm2, %v673_v7, 0  ;;  %p397_p3 = scmp.lt.s32.totalorder (!%p352_p2), %s396_s24, 33  ;;  %v2020_v22 = vld [vmem:[%s2817_s5 + $0x14] ss:$8 sps:$4 sm:$0xff] (!%p352_p2)   ;;  %1104 = vmatprep.subr.bf16.mxu1 (!%p352_p2), %v2017_v18  ;;  %v2022_v23 = vld [vmem:[%s2817_s5 + $0x10] ss:$8 sps:$4 sm:$0xff] (!%p352_p2)  }
   0xc   : > { %v679_v10 = vand.u32 (!%p352_p2), %v2016_v5, %v674_v9  ;;  %v676_v11 = vand.u32 (!%p352_p2), %v2014_v8, %v674_v9  ;;  %1105 = vmatpush1.bf16.msra.mxu1 (!%p352_p2), %v2019_v19  ;;  %v2023_v25 = vld [vmem:[%s2817_s5 + $0x24] ss:$8 sps:$4 sm:$0xff] (!%p352_p2)   ;;  %v2025_v28 = vld [vmem:[%s2817_s5 + $0x20] ss:$8 sps:$4 sm:$0xff] (!%p352_p2)   ;;  %v2026_v29 = vld [vmem:[%s2817_s5 + $0x34] ss:$8 sps:$4 sm:$0xff] (!%p352_p2)  }
   0xd   : > { %1106 = vmatprep.subr.bf16.mxu1 (!%p352_p2), %v2020_v22  ;;  %v2028_v30 = vld [vmem:[%s2817_s5 + $0x30] ss:$8 sps:$4 sm:$0xff] (!%p352_p2)   ;;  %v2029_v31 = vld [vmem:[%s2817_s5 + $0x44] ss:$8 sps:$4 sm:$0xff] (!%p352_p2)   ;;  %v2031_v33 = vld [vmem:[%s2817_s5 + $0x40] ss:$8 sps:$4 sm:$0xff] (!%p352_p2)  }
   0xe   : > { %681 = vmatprep.subr.bf16.mxu0 (!%p352_p2), %v679_v10  ;;  %v2032_v34 = vld [vmem:[%s2817_s5 + $0x54] ss:$8 sps:$4 sm:$0xff] (!%p352_p2)   ;;  %v2034_v37 = vld [vmem:[%s2817_s5 + $0x50] ss:$8 sps:$4 sm:$0xff] (!%p352_p2)   ;;  %v2035_v38 = vld [vmem:[%s2817_s5 + $0x64] ss:$8 sps:$4 sm:$0xff] (!%p352_p2)  }
   0xf   : > { %s2825_s24 = smov (!%p397_p3, %s396_s24), 33  ;;  %v2037_v40 = vld [vmem:[%s2817_s5 + $0x60] ss:$8 sps:$4 sm:$0xff]   ;;  %v2038_v41 = vld [vmem:[%s2817_s5 + $0x74] ss:$8 sps:$4 sm:$0xff]  }
  0x10   : > { %s2204_s27 = sshll.u32 %s2825_s24, 3  ;;  %1107 = vmatpush1.bf16.msra.mxu1 %v2022_v23  ;;  %v2040_v44 = vld [vmem:[%s2817_s5 + $0x70] ss:$8 sps:$4 sm:$0xff]   ;;  %v2041_v46 = vld [vmem:[%s2817_s5 + $0x84] ss:$8 sps:$4 sm:$0xff]  }
  0x11   : > { %s2210_s30 = scalar_lea.vmem %s2813_s1, %s2204_s27  ;;  %1108 = vmatprep.subr.bf16.mxu1 %v2023_v25  ;;  %v2043_v47 = vld [vmem:[%s2817_s5 + $0x80] ss:$8 sps:$4 sm:$0xff]   ;;  %v2044_v48 = vld [vmem:[%s2817_s5 + $0x94] ss:$8 sps:$4 sm:$0xff]   ;;  %v2046_v51 = vld [vmem:[%s2817_s5 + $0x90] ss:$8 sps:$4 sm:$0xff]   ;;  %s2318_s26 = scalar_lea.vmem %s2812_s0, %s2204_s27 }
  0x12   : > { %v443_v12 = vld [vmem:[%s2210_s30] sm:$0xff]  ;;  %v444_v13 = vld [vmem:[%s2210_s30 + $0x8] sm:$0xff]  ;;  %v445_v15 = vld [vmem:[%s2210_s30 + $0x10] sm:$0xff]  ;;  %s2773_s29 = scalar_lea.vmem %s2823_s11, %s2204_s27 }
  0x13   : > { %v460_v14 = vpack.c.bf16 %v444_v13, %v443_v12  ;;  %v446_v16 = vld [vmem:[%s2210_s30 + $0x18] sm:$0xff]  ;;  %v447_v20 = vld [vmem:[%s2210_s30 + $0x20] sm:$0xff]  ;;  %v448_v21 = vld [vmem:[%s2210_s30 + $0x28] sm:$0xff] }
  0x14   : > { %v461_v17 = vpack.c.bf16 %v446_v16, %v445_v15  ;;  %v462_v24 = vpack.c.bf16 %v448_v21, %v447_v20  ;;  %v449_v26 = vld [vmem:[%s2210_s30 + $0x30] sm:$0xff]  ;;  %v450_v27 = vld [vmem:[%s2210_s30 + $0x38] sm:$0xff]  ;;  %1109 = vmatpush1.bf16.msra.mxu1 %v2025_v28  ;;  %v451_v35 = vld [vmem:[%s2210_s30 + $0x40] sm:$0xff] }
  0x15   : > { %1853 = vmatmul.mubr.msk.bf16.vlgmr.msra.gmra.mrb[0].mxu0 %vm479_vm3, %v460_v14  ;;  %v463_v32 = vpack.c.bf16 %v450_v27, %v449_v26  ;;  %1110 = vmatprep.subr.bf16.mxu1 %v2026_v29  ;;  %v452_v36 = vld [vmem:[%s2210_s30 + $0x48] sm:$0xff]  ;;  %v453_v42 = vld [vmem:[%s2210_s30 + $0x50] sm:$0xff]  ;;  %v454_v43 = vld [vmem:[%s2210_s30 + $0x58] sm:$0xff] }
  0x16   : > { %682 = vmatpush1.bf16.msra.mxu0 %v676_v11  ;;  %556 = vmatprep.mubr.bf16.mxu0 %v2121_v4  ;;  %v464_v39 = vpack.c.bf16 %v452_v36, %v451_v35  ;;  %v465_v45 = vpack.c.bf16 %v454_v43, %v453_v42  ;;  %v455_v49 = vld [vmem:[%s2210_s30 + $0x60] sm:$0xff]  ;;  %v456_v50 = vld [vmem:[%s2210_s30 + $0x68] sm:$0xff]  ;;  %v2050_v55 = vld [vmem:[%s2817_s5 + $0xb4] ss:$8 sps:$4 sm:$0xff]  }
  0x17   : > { %v466_v52 = vpack.c.bf16 %v456_v50, %v455_v49  ;;  %v2047_v53 = vld [vmem:[%s2817_s5 + $0xa4] ss:$8 sps:$4 sm:$0xff]   ;;  %v2049_v54 = vld [vmem:[%s2817_s5 + $0xa0] ss:$8 sps:$4 sm:$0xff]   ;;  %v457_v56 = vld [vmem:[%s2210_s30 + $0x70] sm:$0xff] }
  0x18   : > { %1111 = vmatpush1.bf16.msra.mxu1 %v2028_v30  ;;  %v458_v57 = vld [vmem:[%s2210_s30 + $0x78] sm:$0xff]  ;;  %v459_v59 = vld [vmem:[%s2210_s30 + $0x80] sm:$0xff]  ;;  %v416_v62 = vld [vmem:[%s2318_s26 + $0x8] sm:$0xff] }
  0x19   : > { %1112 = vmatprep.subr.bf16.mxu1 %v2029_v31  ;;  %v467_v58 = vpack.c.bf16 %v458_v57, %v457_v56  ;;  %v468_v60 = vpack.c.bf16 %v459_v59, %v459_v59  ;;  %v415_v61 = vld [vmem:[%s2318_s26] sm:$0xff]  ;;  %v417_v0 = vld [vmem:[%s2318_s26 + $0x10] sm:$0xff]  ;;  %v418_v1 = vld [vmem:[%s2318_s26 + $0x18] sm:$0xff] }
  0x1a   : > { %v432_v63 = vpack.c.bf16 %v416_v62, %v415_v61  ;;  %v433_v2 = vpack.c.bf16 %v418_v1, %v417_v0  ;;  %v419_v3 = vld [vmem:[%s2318_s26 + $0x20] sm:$0xff]  ;;  %v420_v5 = vld [vmem:[%s2318_s26 + $0x28] sm:$0xff]  ;;  %v421_v7 = vld [vmem:[%s2318_s26 + $0x30] sm:$0xff] }
  0x1b   : > { %v434_v6 = vpack.c.bf16 %v420_v5, %v419_v3  ;;  %v422_v8 = vld [vmem:[%s2318_s26 + $0x38] sm:$0xff]  ;;  %v423_v10 = vld [vmem:[%s2318_s26 + $0x40] sm:$0xff]  ;;  %v424_v11 = vld [vmem:[%s2318_s26 + $0x48] sm:$0xff] }
  0x1c   : > { %1113 = vmatpush1.bf16.msra.mxu1 %v2031_v33  ;;  %v435_v9 = vpack.c.bf16 %v422_v8, %v421_v7  ;;  %v436_v12 = vpack.c.bf16 %v424_v11, %v423_v10  ;;  %v425_v13 = vld [vmem:[%s2318_s26 + $0x50] sm:$0xff]  ;;  %v426_v14 = vld [vmem:[%s2318_s26 + $0x58] sm:$0xff]  ;;  %v427_v16 = vld [vmem:[%s2318_s26 + $0x60] sm:$0xff] }
  0x1d   : > { %1854 = vmatmul.mubr.msk.bf16.gmra.mrb[4].mxu0 %vm479_vm3, %v461_v17  ;;  %1114 = vmatprep.subr.bf16.mxu1 %v2032_v34  ;;  %v437_v15 = vpack.c.bf16 %v426_v14, %v425_v13  ;;  %v428_v17 = vld [vmem:[%s2318_s26 + $0x68] sm:$0xff]  ;;  %v429_v19 = vld [vmem:[%s2318_s26 + $0x70] sm:$0xff]  ;;  %v430_v20 = vld [vmem:[%s2318_s26 + $0x78] sm:$0xff] }
  0x1e   : > { %566 = vmatprep.mubr.bf16.mxu0 %v2121_v4  ;;  %v438_v18 = vpack.c.bf16 %v428_v17, %v427_v16  ;;  %v439_v21 = vpack.c.bf16 %v430_v20, %v429_v19  ;;  %v431_v22 = vld [vmem:[%s2318_s26 + $0x80] sm:$0xff]  ;;  %v2058_v27 = vld [vmem:[%s2817_s5 + $0xd0] ss:$8 sps:$4 sm:$0xff]   ;;  %v2062_v30 = vld [vmem:[%s2817_s5 + $0xf4] ss:$8 sps:$4 sm:$0xff]  }
  0x1f   : > { %v440_v23 = vpack.c.bf16 %v431_v22, %v431_v22  ;;  %v2053_v25 = vld [vmem:[%s2817_s5 + $0xc4] ss:$8 sps:$4 sm:$0xff]   ;;  %v2055_v26 = vld [vmem:[%s2817_s5 + $0xc0] ss:$8 sps:$4 sm:$0xff]   ;;  %v2064_v31 = vld [vmem:[%s2817_s5 + $0xf0] ss:$8 sps:$4 sm:$0xff]  }
  0x20   : > { %1115 = vmatpush1.bf16.msra.mxu1 %v2034_v37  ;;  %v2059_v28 = vld [vmem:[%s2817_s5 + $0xe4] ss:$8 sps:$4 sm:$0xff]   ;;  %v2061_v29 = vld [vmem:[%s2817_s5 + $0xe0] ss:$8 sps:$4 sm:$0xff]   ;;  %v2394_v34 = vld [vmem:[%s2819_s7 + $0x14] ss:$8 sps:$4 sm:$0xff]  }
  0x21   : > { %1116 = vmatprep.subr.bf16.mxu1 %v2035_v38  ;;  %v2067_v33 = vld [vmem:[%s2819_s7 + $0x4] ss:$8 sps:$4 sm:$0xff]   ;;  %v2400_v35 = vld [vmem:[%s2819_s7 + $0x10] ss:$8 sps:$4 sm:$0xff]   ;;  %v2412_v37 = vld [vmem:[%s2819_s7 + $0x20] ss:$8 sps:$4 sm:$0xff]  }
  0x22   : > { %1481 = vmatprep.subr.bf16.mxu0 %v2067_v33  ;;  %v2406_v36 = vld [vmem:[%s2819_s7 + $0x24] ss:$8 sps:$4 sm:$0xff]   ;;  %v2418_v38 = vld [vmem:[%s2819_s7 + $0x34] ss:$8 sps:$4 sm:$0xff]   ;;  %v2448_v43 = vld [vmem:[%s2819_s7 + $0x50] ss:$8 sps:$4 sm:$0xff]  }
  0x23   : > { %v2442_v42 = vld [vmem:[%s2819_s7 + $0x54] ss:$8 sps:$4 sm:$0xff]   ;;  %v2484_v49 = vld [vmem:[%s2819_s7 + $0x80] ss:$8 sps:$4 sm:$0xff]   ;;  %v2520_v57 = vld [vmem:[%s2819_s7 + $0xb0] ss:$8 sps:$4 sm:$0xff]  }
  0x24   : > { %1117 = vmatpush1.bf16.msra.mxu1 %v2037_v40  ;;  %v2430_v40 = vld [vmem:[%s2819_s7 + $0x44] ss:$8 sps:$4 sm:$0xff]   ;;  %v2490_v50 = vld [vmem:[%s2819_s7 + $0x94] ss:$8 sps:$4 sm:$0xff]   ;;  %v2543_v1 = vld [vmem:[%s2819_s7 + $0xc0] ss:$8 sps:$4 sm:$0xff]  }
  0x25   : > { %1855 = vmatmul.mubr.msk.bf16.gmra.mrb[8].mxu0 %vm479_vm3, %v462_v24  ;;  %1118 = vmatprep.subr.bf16.mxu1 %v2038_v41  ;;  %v2052_v24 = vld [vmem:[%s2817_s5 + $0xb0] ss:$8 sps:$4 sm:$0xff]   ;;  %v2436_v41 = vld [vmem:[%s2819_s7 + $0x40] ss:$8 sps:$4 sm:$0xff]   ;;  %v2549_v3 = vld [vmem:[%s2819_s7 + $0xd4] ss:$8 sps:$4 sm:$0xff]  }
  0x26   : > { %576 = vmatprep.mubr.bf16.mxu0 %v2121_v4  ;;  %v2561_v7 = vld [vmem:[%s2819_s7 + $0xd0] ss:$8 sps:$4 sm:$0xff]  }
  0x28   : > { %1119 = vmatpush1.bf16.msra.mxu1 %v2040_v44  ;;  %v2454_v44 = vld [vmem:[%s2819_s7 + $0x64] ss:$8 sps:$4 sm:$0xff]  }
  0x29   : > { %1120 = vmatprep.subr.bf16.mxu1 %v2041_v46  ;;  %v2466_v46 = vld [vmem:[%s2819_s7 + $0x74] ss:$8 sps:$4 sm:$0xff]  }
  0x2c   : > { %1121 = vmatpush1.bf16.msra.mxu1 %v2043_v47  ;;  %v2472_v47 = vld [vmem:[%s2819_s7 + $0x70] ss:$8 sps:$4 sm:$0xff]  }
  0x2d   : > { %1856 = vmatmul.mubr.msk.bf16.gmra.mrb[12].mxu0 %vm479_vm3, %v463_v32  ;;  %1122 = vmatprep.subr.bf16.mxu1 %v2044_v48  ;;  %v2386_v32 = vld [vmem:[%s2819_s7] ss:$8 sps:$4 sm:$0xff]   ;;  %v2478_v48 = vld [vmem:[%s2819_s7 + $0x84] ss:$8 sps:$4 sm:$0xff]  }
  0x2e   : > { %586 = vmatprep.mubr.bf16.mxu0 %v2121_v4 }
  0x30   : > { %1123 = vmatpush1.bf16.msra.mxu1 %v2046_v51  ;;  %v2496_v51 = vld [vmem:[%s2819_s7 + $0x90] ss:$8 sps:$4 sm:$0xff]  }
  0x31   : > { %1124 = vmatprep.subr.bf16.mxu1 %v2047_v53  ;;  %v804_v53 = vlaneseq }
  0x33   : > { %v805_v56 = vshrl.u32 %v804_v53, 7 }
  0x34   : > { %1125 = vmatpush1.bf16.msra.mxu1 %v2049_v54  ;;  %v2508_v54 = vld [vmem:[%s2819_s7 + $0xa0] ss:$8 sps:$4 sm:$0xff]  }
  0x35   : > { %1857 = vmatmul.mubr.msk.bf16.gmra.mrb[16].mxu0 %vm479_vm3, %v464_v39  ;;  %1126 = vmatprep.subr.bf16.mxu1 %v2050_v55  ;;  %v2424_v39 = vld [vmem:[%s2819_s7 + $0x30] ss:$8 sps:$4 sm:$0xff]   ;;  %v2514_v55 = vld [vmem:[%s2819_s7 + $0xb4] ss:$8 sps:$4 sm:$0xff]   ;;  %v2532_v61 = vsub.s32 0, %v805_v56  ;;  %v2537_v0 = vsub.s32 1, %v805_v56 }
  0x36   : > { %596 = vmatprep.mubr.bf16.mxu0 %v2121_v4 }
  0x38   : > { %1127 = vmatpush1.bf16.msra.mxu1 %v2052_v24 }
  0x39   : > { %1128 = vmatprep.subr.bf16.mxu1 %v2053_v25 }
  0x3c   : > { %1129 = vmatpush1.bf16.msra.mxu1 %v2055_v26 }
  0x3d   : > { %1858 = vmatmul.mubr.msk.bf16.gmra.mrb[20].mxu0 %vm479_vm3, %v465_v45  ;;  %v2460_v45 = vld [vmem:[%s2819_s7 + $0x60] ss:$8 sps:$4 sm:$0xff]  }
  0x3e   : > { %606 = vmatprep.mubr.bf16.mxu0 %v2121_v4 }
  0x45   : > { %1859 = vmatmul.mubr.msk.bf16.gmra.mrb[24].mxu0 %vm479_vm3, %v466_v52  ;;  %v2502_v52 = vld [vmem:[%s2819_s7 + $0xa4] ss:$8 sps:$4 sm:$0xff]  }
  0x46   : > { %616 = vmatprep.mubr.bf16.mxu0 %v2121_v4 }
  0x4d   : > { %1860 = vmatmul.mubr.msk.bf16.gmra.mrb[28].mxu0 %vm479_vm3, %v467_v58  ;;  %v2526_v58 = vld [vmem:[%s2819_s7 + $0xc4] ss:$8 sps:$4 sm:$0xff]  }
  0x4e   : > { %626 = vmatprep.mubr.bf16.mxu0 %v2121_v4 }
  0x55   : > { %1861 = vmatmul.mubr.msk.bf16.gmra.mrb[32].mxu0 %vm479_vm3, %v468_v60 }
  0x56   : > { %713 = vmatprep.mubr.bf16.mxu0 %v2121_v4 }
  0x5d   : > { %1864 = vmatmul.mubr.msk.bf16.vlgmr.msra.gmra.mrb[0].mxu0 %vm643_vm4, %v432_v63  ;;  %v802_v63 = vld [vmem:[%s2816_s4] sm:$0x3] }
  0x5e   : > { %723 = vmatprep.mubr.bf16.mxu0 %v2121_v4  ;;  %1482 = vmatpush1.bf16.msra.mxu0 %v2386_v32  ;;  %v2552_v5 = vrot.slane %v802_v63, %v2532_v61 }
  0x5f   : > { %1483 = vmatprep.subr.bf16.mxu0 %v2394_v34 }
  0x62   : > { %1484 = vmatpush1.bf16.msra.mxu0 %v2400_v35 }
  0x63   : > { %1485 = vmatprep.subr.bf16.mxu0 %v2406_v36 }
  0x65   : > { %1865 = vmatmul.mubr.msk.bf16.gmra.mrb[4].mxu0 %vm643_vm4, %v433_v2 }
  0x66   : > { %733 = vmatprep.mubr.bf16.mxu0 %v2121_v4  ;;  %1486 = vmatpush1.bf16.msra.mxu0 %v2412_v37 }
  0x67   : > { %1487 = vmatprep.subr.bf16.mxu0 %v2418_v38 }
  0x6a   : > { %1488 = vmatpush1.bf16.msra.mxu0 %v2424_v39 }
  0x6b   : > { %1489 = vmatprep.subr.bf16.mxu0 %v2430_v40 }
  0x6d   : > { %1866 = vmatmul.mubr.msk.bf16.gmra.mrb[8].mxu0 %vm643_vm4, %v434_v6  ;;  %v2555_v6 = vrot.slane %v802_v63, %v2537_v0 }
  0x6e   : > { %743 = vmatprep.mubr.bf16.mxu0 %v2121_v4  ;;  %1490 = vmatpush1.bf16.msra.mxu0 %v2436_v41 }
  0x6f   : > { %1491 = vmatprep.subr.bf16.mxu0 %v2442_v42 }
  0x72   : > { %1492 = vmatpush1.bf16.msra.mxu0 %v2448_v43 }
  0x73   : > { %1493 = vmatprep.subr.bf16.mxu0 %v2454_v44 }
  0x75   : > { %1867 = vmatmul.mubr.msk.bf16.gmra.mrb[12].mxu0 %vm643_vm4, %v435_v9 }
  0x76   : > { %753 = vmatprep.mubr.bf16.mxu0 %v2121_v4  ;;  %1494 = vmatpush1.bf16.msra.mxu0 %v2460_v45 }
  0x77   : > { %1495 = vmatprep.subr.bf16.mxu0 %v2466_v46 }
  0x7a   : > { %1496 = vmatpush1.bf16.msra.mxu0 %v2472_v47 }
  0x7b   : > { %1497 = vmatprep.subr.bf16.mxu0 %v2478_v48 }
  0x7d   : > { %1868 = vmatmul.mubr.msk.bf16.gmra.mrb[16].mxu0 %vm643_vm4, %v436_v12 }
  0x7e   : > { %763 = vmatprep.mubr.bf16.mxu0 %v2121_v4  ;;  %1498 = vmatpush1.bf16.msra.mxu0 %v2484_v49 }
  0x7f   : > { %1499 = vmatprep.subr.bf16.mxu0 %v2490_v50 }
  0x82   : > { %1500 = vmatpush1.bf16.msra.mxu0 %v2496_v51 }
  0x83   : > { %1501 = vmatprep.subr.bf16.mxu0 %v2502_v52 }
  0x85   : > { %1869 = vmatmul.mubr.msk.bf16.gmra.mrb[20].mxu0 %vm643_vm4, %v437_v15 }
  0x86   : > { %773 = vmatprep.mubr.bf16.mxu0 %v2121_v4  ;;  %1502 = vmatpush1.bf16.msra.mxu0 %v2508_v54 }
  0x87   : > { %1503 = vmatprep.subr.bf16.mxu0 %v2514_v55 }
  0x8a   : > { %1504 = vmatpush1.bf16.msra.mxu0 %v2520_v57 }
  0x8b   : > { %1505 = vmatprep.subr.bf16.mxu0 %v2526_v58 }
  0x8d   : > { %1870 = vmatmul.mubr.msk.bf16.gmra.mrb[24].mxu0 %vm643_vm4, %v438_v18 }
  0x8e   : > { %783 = vmatprep.mubr.bf16.mxu0 %v2121_v4  ;;  %1506 = vmatpush1.bf16.msra.mxu0 %v2543_v1 }
  0x8f   : > { %1507 = vmatprep.subr.bf16.mxu0 %v2549_v3 }
  0x92   : > { %1508 = vmatpush1.bf16.msra.mxu0 %v2561_v7 }
  0x95   : > { %1871 = vmatmul.mubr.msk.bf16.gmra.mrb[28].mxu0 %vm643_vm4, %v439_v21 }
  0x96   : > { %793 = vmatprep.mubr.bf16.mxu0 %v2121_v4  ;;  %v2056_v4 = vld [vmem:[%s2817_s5 + $0xd4] ss:$8 sps:$4 sm:$0xff]  }
  0x97   : > { %1130 = vmatprep.subr.bf16.mxu1 %v2056_v4 }
  0x98   : > { %1131 = vmatpush1.bf16.msra.mxu1 %v2058_v27 }
  0x99   : > { %1132 = vmatprep.subr.bf16.mxu1 %v2059_v28 }
  0x9c   : > { %1133 = vmatpush1.bf16.msra.mxu1 %v2061_v29 }
  0x9d   : > { %1872 = vmatmul.mubr.msk.bf16.gmra.mrb[36].mxu0 %vm643_vm4, %v440_v23  ;;  %1134 = vmatprep.subr.bf16.mxu1 %v2062_v30 }
  0xa0   : > { %1135 = vmatpush1.bf16.msra.mxu1 %v2064_v31 }
  0xa1   : > { %1940 = vmatprep.subr.bf16.mxu1 %v2067_v33 }
 0x128   : > { %v2528_v59 = vpop.f32.mrb[32].mxu0 }
 0x129   : > { %v2530_v60 = vpop.f32.mrb[33].mxu0 }
 0x12a   : > { %v632_v62 = vpop.f32.mrb[34].mxu0 }
 0x12b   : > { %v633_v2 = vpop.f32.mrb[35].mxu0 }
 0x130   : > { %v715_v8 = vpop.f32.mrb[0].mxu0 }
 0x131   : > { %v814_v9 = vadd.f32 %v2552_v5, %v715_v8  ;;  %v717_v10 = vpop.f32.mrb[1].mxu0 }
 0x132   : > { %v815_v11 = vadd.f32 %v2555_v6, %v717_v10  ;;  %v719_v12 = vpop.f32.mrb[2].mxu0 }
 0x133   : > { %v816_v13 = vadd.f32 %v2552_v5, %v719_v12  ;;  %v721_v14 = vpop.f32.mrb[3].mxu0  ;;  %v848_v16 = vmax.f32 %v814_v9, 0.0 }
 0x134   : > { %v817_v15 = vadd.f32 %v2555_v6, %v721_v14  ;;  %v849_v18 = vmax.f32 %v815_v11, 0.0 }
 0x135   : > { %v850_v17 = vmax.f32 %v816_v13, 0.0 }
 0x136   : > { %v851_v19 = vmax.f32 %v817_v15, 0.0 }
 0x137   : > { %v882_v20 = vpack.c.bf16 %v850_v17, %v848_v16 }
 0x138   : > { %v725_v21 = vpop.f32.mrb[4].mxu0  ;;  %v883_v22 = vpack.c.bf16 %v851_v19, %v849_v18 }
 0x139   : > { %v818_v23 = vadd.f32 %v2552_v5, %v725_v21  ;;  %v727_v24 = vpop.f32.mrb[5].mxu0 }
 0x13a   : > { %v819_v25 = vadd.f32 %v2555_v6, %v727_v24  ;;  %v729_v26 = vpop.f32.mrb[6].mxu0  ;;  %1136 = vmatprep.mubr.bf16.mxu1 %v883_v22 }
 0x13b   : > { %v820_v4 = vadd.f32 %v2552_v5, %v729_v26  ;;  %v731_v27 = vpop.f32.mrb[7].mxu0  ;;  %1137 = vmatmul.mubr.bf16.vlgmr.msra.gmra.mrb[0].mxu1 %v882_v20  ;;  %v852_v29 = vmax.f32 %v818_v23, 0.0 }
 0x13c   : > { %v821_v28 = vadd.f32 %v2555_v6, %v731_v27  ;;  %1956 = vmatpush1.bf16.msra.mxu1 %v2386_v32  ;;  %v853_v31 = vmax.f32 %v819_v25, 0.0 }
 0x13d   : > { %v854_v30 = vmax.f32 %v820_v4, 0.0  ;;  %1941 = vmatprep.subr.bf16.mxu1 %v2394_v34 }
 0x13e   : > { %v855_v33 = vmax.f32 %v821_v28, 0.0 }
 0x13f   : > { %v884_v53 = vpack.c.bf16 %v854_v30, %v852_v29 }
 0x140   : > { %v885_v56 = vpack.c.bf16 %v855_v33, %v853_v31  ;;  %v735_v62 = vpop.f32.mrb[8].mxu0  ;;  %1957 = vmatpush1.bf16.msra.mxu1 %v2400_v35 }
 0x141   : > { %v822_v63 = vadd.f32 %v2552_v5, %v735_v62  ;;  %v737_v2 = vpop.f32.mrb[9].mxu0  ;;  %1942 = vmatprep.subr.bf16.mxu1 %v2406_v36 }
 0x142   : > { %v823_v8 = vadd.f32 %v2555_v6, %v737_v2  ;;  %v739_v9 = vpop.f32.mrb[10].mxu0  ;;  %1146 = vmatprep.mubr.bf16.mxu1 %v885_v56 }
 0x143   : > { %v824_v32 = vadd.f32 %v2552_v5, %v739_v9  ;;  %v741_v10 = vpop.f32.mrb[11].mxu0  ;;  %1147 = vmatmul.mubr.bf16.gmra.mrb[4].mxu1 %v884_v53  ;;  %v856_v11 = vmax.f32 %v822_v63, 0.0 }
 0x144   : > { %v825_v34 = vadd.f32 %v2555_v6, %v741_v10  ;;  %1958 = vmatpush1.bf16.msra.mxu1 %v2412_v37  ;;  %v857_v35 = vmax.f32 %v823_v8, 0.0 }
 0x145   : > { %v858_v12 = vmax.f32 %v824_v32, 0.0  ;;  %1943 = vmatprep.subr.bf16.mxu1 %v2418_v38 }
 0x146   : > { %v859_v13 = vmax.f32 %v825_v34, 0.0 }
 0x147   : > { %v886_v14 = vpack.c.bf16 %v858_v12, %v856_v11 }
 0x148   : > { %v887_v36 = vpack.c.bf16 %v859_v13, %v857_v35  ;;  %v745_v15 = vpop.f32.mrb[12].mxu0  ;;  %1959 = vmatpush1.bf16.msra.mxu1 %v2424_v39 }
 0x149   : > { %v826_v16 = vadd.f32 %v2552_v5, %v745_v15  ;;  %v747_v17 = vpop.f32.mrb[13].mxu0  ;;  %1944 = vmatprep.subr.bf16.mxu1 %v2430_v40 }
 0x14a   : > { %v827_v18 = vadd.f32 %v2555_v6, %v747_v17  ;;  %v749_v19 = vpop.f32.mrb[14].mxu0  ;;  %1156 = vmatprep.mubr.bf16.mxu1 %v887_v36 }
 0x14b   : > { %v828_v37 = vadd.f32 %v2552_v5, %v749_v19  ;;  %v751_v20 = vpop.f32.mrb[15].mxu0  ;;  %1157 = vmatmul.mubr.bf16.gmra.mrb[8].mxu1 %v886_v14  ;;  %v860_v21 = vmax.f32 %v826_v16, 0.0 }
 0x14c   : > { %v829_v38 = vadd.f32 %v2555_v6, %v751_v20  ;;  %1960 = vmatpush1.bf16.msra.mxu1 %v2436_v41  ;;  %v861_v39 = vmax.f32 %v827_v18, 0.0 }
 0x14d   : > { %v862_v22 = vmax.f32 %v828_v37, 0.0  ;;  %1945 = vmatprep.subr.bf16.mxu1 %v2442_v42 }
 0x14e   : > { %v863_v23 = vmax.f32 %v829_v38, 0.0 }
 0x14f   : > { %v888_v24 = vpack.c.bf16 %v862_v22, %v860_v21 }
 0x150   : > { %v889_v40 = vpack.c.bf16 %v863_v23, %v861_v39  ;;  %v755_v25 = vpop.f32.mrb[16].mxu0  ;;  %1961 = vmatpush1.bf16.msra.mxu1 %v2448_v43 }
 0x151   : > { %v830_v26 = vadd.f32 %v2552_v5, %v755_v25  ;;  %v757_v4 = vpop.f32.mrb[17].mxu0  ;;  %1946 = vmatprep.subr.bf16.mxu1 %v2454_v44 }
 0x152   : > { %v831_v27 = vadd.f32 %v2555_v6, %v757_v4  ;;  %v759_v28 = vpop.f32.mrb[18].mxu0  ;;  %1166 = vmatprep.mubr.bf16.mxu1 %v889_v40 }
 0x153   : > { %v832_v41 = vadd.f32 %v2552_v5, %v759_v28  ;;  %v761_v29 = vpop.f32.mrb[19].mxu0  ;;  %1167 = vmatmul.mubr.bf16.gmra.mrb[12].mxu1 %v888_v24  ;;  %v864_v30 = vmax.f32 %v830_v26, 0.0 }
 0x154   : > { %v833_v42 = vadd.f32 %v2555_v6, %v761_v29  ;;  %1962 = vmatpush1.bf16.msra.mxu1 %v2460_v45  ;;  %v865_v43 = vmax.f32 %v831_v27, 0.0 }
 0x155   : > { %v866_v31 = vmax.f32 %v832_v41, 0.0  ;;  %1947 = vmatprep.subr.bf16.mxu1 %v2466_v46 }
 0x156   : > { %v867_v33 = vmax.f32 %v833_v42, 0.0 }
 0x157   : > { %v890_v53 = vpack.c.bf16 %v866_v31, %v864_v30 }
 0x158   : > { %v891_v44 = vpack.c.bf16 %v867_v33, %v865_v43  ;;  %v765_v56 = vpop.f32.mrb[20].mxu0  ;;  %1963 = vmatpush1.bf16.msra.mxu1 %v2472_v47 }
 0x159   : > { %v834_v62 = vadd.f32 %v2552_v5, %v765_v56  ;;  %v767_v63 = vpop.f32.mrb[21].mxu0  ;;  %1948 = vmatprep.subr.bf16.mxu1 %v2478_v48 }
 0x15a   : > { %v835_v2 = vadd.f32 %v2555_v6, %v767_v63  ;;  %v769_v8 = vpop.f32.mrb[22].mxu0  ;;  %1176 = vmatprep.mubr.bf16.mxu1 %v891_v44 }
 0x15b   : > { %v836_v45 = vadd.f32 %v2552_v5, %v769_v8  ;;  %v771_v9 = vpop.f32.mrb[23].mxu0  ;;  %1177 = vmatmul.mubr.bf16.gmra.mrb[16].mxu1 %v890_v53  ;;  %v868_v32 = vmax.f32 %v834_v62, 0.0 }
 0x15c   : > { %v837_v46 = vadd.f32 %v2555_v6, %v771_v9  ;;  %1964 = vmatpush1.bf16.msra.mxu1 %v2484_v49  ;;  %v869_v47 = vmax.f32 %v835_v2, 0.0 }
 0x15d   : > { %v870_v10 = vmax.f32 %v836_v45, 0.0  ;;  %1949 = vmatprep.subr.bf16.mxu1 %v2490_v50 }
 0x15e   : > { %v871_v34 = vmax.f32 %v837_v46, 0.0 }
 0x15f   : > { %v892_v11 = vpack.c.bf16 %v870_v10, %v868_v32 }
 0x160   : > { %v893_v48 = vpack.c.bf16 %v871_v34, %v869_v47  ;;  %v775_v12 = vpop.f32.mrb[24].mxu0  ;;  %1965 = vmatpush1.bf16.msra.mxu1 %v2496_v51 }
 0x161   : > { %v838_v35 = vadd.f32 %v2552_v5, %v775_v12  ;;  %v777_v13 = vpop.f32.mrb[25].mxu0  ;;  %1950 = vmatprep.subr.bf16.mxu1 %v2502_v52 }
 0x162   : > { %v839_v14 = vadd.f32 %v2555_v6, %v777_v13  ;;  %v779_v36 = vpop.f32.mrb[26].mxu0  ;;  %1186 = vmatprep.mubr.bf16.mxu1 %v893_v48 }
 0x163   : > { %v840_v49 = vadd.f32 %v2552_v5, %v779_v36  ;;  %v781_v15 = vpop.f32.mrb[27].mxu0  ;;  %1187 = vmatmul.mubr.bf16.gmra.mrb[20].mxu1 %v892_v11  ;;  %v872_v16 = vmax.f32 %v838_v35, 0.0 }
 0x164   : > { %v841_v50 = vadd.f32 %v2555_v6, %v781_v15  ;;  %1966 = vmatpush1.bf16.msra.mxu1 %v2508_v54  ;;  %v873_v51 = vmax.f32 %v839_v14, 0.0 }
 0x165   : > { %v874_v17 = vmax.f32 %v840_v49, 0.0  ;;  %1951 = vmatprep.subr.bf16.mxu1 %v2514_v55 }
 0x166   : > { %v875_v18 = vmax.f32 %v841_v50, 0.0 }
 0x167   : > { %v894_v19 = vpack.c.bf16 %v874_v17, %v872_v16 }
 0x168   : > { %v895_v52 = vpack.c.bf16 %v875_v18, %v873_v51  ;;  %v785_v37 = vpop.f32.mrb[28].mxu0  ;;  %1967 = vmatpush1.bf16.msra.mxu1 %v2520_v57 }
 0x169   : > { %v842_v20 = vadd.f32 %v2552_v5, %v785_v37  ;;  %v787_v38 = vpop.f32.mrb[29].mxu0  ;;  %1952 = vmatprep.subr.bf16.mxu1 %v2526_v58 }
 0x16a   : > { %v843_v21 = vadd.f32 %v2555_v6, %v787_v38  ;;  %v789_v22 = vpop.f32.mrb[30].mxu0  ;;  %1196 = vmatprep.mubr.bf16.mxu1 %v895_v52 }
 0x16b   : > { %v844_v54 = vadd.f32 %v2552_v5, %v789_v22  ;;  %v791_v39 = vpop.f32.mrb[31].mxu0  ;;  %1197 = vmatmul.mubr.bf16.gmra.mrb[24].mxu1 %v894_v19  ;;  %v876_v23 = vmax.f32 %v842_v20, 0.0 }
 0x16c   : > { %v845_v55 = vadd.f32 %v2555_v6, %v791_v39  ;;  %1968 = vmatpush1.bf16.msra.mxu1 %v2543_v1  ;;  %v877_v57 = vmax.f32 %v843_v21, 0.0 }
 0x16d   : > { %v878_v24 = vmax.f32 %v844_v54, 0.0  ;;  %1953 = vmatprep.subr.bf16.mxu1 %v2549_v3 }
 0x16e   : > { %v879_v40 = vmax.f32 %v845_v55, 0.0 }
 0x16f   : > { %v896_v25 = vpack.c.bf16 %v878_v24, %v876_v23 }
 0x170   : > { %v897_v58 = vpack.c.bf16 %v879_v40, %v877_v57  ;;  %v795_v26 = vpop.f32.mrb[36].mxu0  ;;  %1969 = vmatpush1.bf16.msra.mxu1 %v2561_v7  ;;  %v932_v7 = vld [vmem:[%s2818_s6] sm:$0x3] }
 0x171   : > { %v796_v4 = vadd.f32 %v795_v26, %v2528_v59  ;;  %v797_v27 = vpop.f32.mrb[37].mxu0  ;;  %v2109_v59 = vld [vmem:[%s2819_s7 + $0xe4] ss:$8 sps:$4 sm:$0xff]   ;;  %v2644_v33 = vrot.slane %v932_v7, %v2532_v61  ;;  %v2647_v53 = vrot.slane %v932_v7, %v2537_v0 }
 0x172   : > { %v798_v28 = vadd.f32 %v797_v27, %v2530_v60  ;;  %v799_v41 = vpop.f32.mrb[38].mxu0  ;;  %1206 = vmatprep.mubr.bf16.mxu1 %v897_v58  ;;  %v2107_v60 = vld [vmem:[%s2819_s7 + $0xe0] ss:$8 sps:$4 sm:$0xff]   ;;  %1509 = vmatprep.subr.bf16.mxu0 %v2109_v59 }
 0x173   : > { %v846_v1 = vadd.f32 %v2552_v5, %v796_v4  ;;  %v800_v29 = vpop.f32.mrb[39].mxu0  ;;  %1207 = vmatmul.mubr.bf16.gmra.mrb[28].mxu1 %v896_v25  ;;  %1954 = vmatprep.subr.bf16.mxu1 %v2109_v59  ;;  %v2112_v5 = vld [vmem:[%s2819_s7 + $0xf4] ss:$8 sps:$4 sm:$0xff]  }
 0x174   : > { %v847_v3 = vadd.f32 %v2555_v6, %v798_v28  ;;  %1510 = vmatpush1.bf16.msra.mxu0 %v2107_v60  ;;  %1970 = vmatpush1.bf16.msra.mxu1 %v2107_v60  ;;  %v2110_v6 = vld [vmem:[%s2819_s7 + $0xf0] ss:$8 sps:$4 sm:$0xff]  }
 0x175   : > { %v880_v42 = vmax.f32 %v846_v1, 0.0  ;;  %1511 = vmatprep.subr.bf16.mxu0 %v2112_v5  ;;  %1955 = vmatprep.subr.bf16.mxu1 %v2112_v5 }
 0x176   : > { %v881_v30 = vmax.f32 %v847_v3, 0.0 }
 0x177   : > { %v898_v43 = vpack.c.bf16 %v880_v42, %v880_v42 }
 0x178   : > { %v899_v31 = vpack.c.bf16 %v881_v30, %v881_v30  ;;  %1512 = vmatpush1.bf16.msra.mxu0 %v2110_v6  ;;  %1971 = vmatpush1.bf16.msra.mxu1 %v2110_v6 }
 0x17a   : > { %1216 = vmatprep.mubr.bf16.mxu1 %v899_v31 }
 0x17b   : > { %1217 = vmatmul.mubr.bf16.gmra.mrb[32].mxu1 %v898_v43 }
 0x20e   : > { %v1138_v44 = vpop.f32.mrb[0].mxu1 }
 0x20f   : > { %v1139_v56 = vadd.f32 %v1138_v44, %v2644_v33  ;;  %v1140_v62 = vpop.f32.mrb[1].mxu1 }
 0x210   : > { %v1141_v63 = vadd.f32 %v1140_v62, %v2647_v53  ;;  %v1142_v2 = vpop.f32.mrb[2].mxu1 }
 0x211   : > { %v1143_v8 = vadd.f32 %v1142_v2, %v2644_v33  ;;  %v1144_v45 = vpop.f32.mrb[3].mxu1  ;;  %v1225_v46 = vmax.f32 %v1139_v56, 0.0 }
 0x212   : > { %v1145_v9 = vadd.f32 %v1144_v45, %v2647_v53  ;;  %v1226_v10 = vmax.f32 %v1141_v63, 0.0 }
 0x213   : > { %v1227_v32 = vmax.f32 %v1143_v8, 0.0 }
 0x214   : > { %v1228_v47 = vmax.f32 %v1145_v9, 0.0 }
 0x215   : > { %v1259_v34 = vpack.c.bf16 %v1227_v32, %v1225_v46 }
 0x216   : > { %v1260_v11 = vpack.c.bf16 %v1228_v47, %v1226_v10  ;;  %v1148_v48 = vpop.f32.mrb[4].mxu1 }
 0x217   : > { %v1149_v12 = vadd.f32 %v1148_v48, %v2644_v33  ;;  %v1150_v35 = vpop.f32.mrb[5].mxu1 }
 0x218   : > { %v1151_v13 = vadd.f32 %v1150_v35, %v2647_v53  ;;  %v1152_v14 = vpop.f32.mrb[6].mxu1  ;;  %1513 = vmatprep.mubr.bf16.mxu0 %v1260_v11 }
 0x219   : > { %v1153_v36 = vadd.f32 %v1152_v14, %v2644_v33  ;;  %v1154_v49 = vpop.f32.mrb[7].mxu1  ;;  %1514 = vmatmul.mubr.bf16.vlgmr.msra.gmra.mrb[40].mxu0 %v1259_v34  ;;  %v1229_v50 = vmax.f32 %v1149_v12, 0.0 }
 0x21a   : > { %v1155_v15 = vadd.f32 %v1154_v49, %v2647_v53  ;;  %v1230_v17 = vmax.f32 %v1151_v13, 0.0 }
 0x21b   : > { %v1231_v16 = vmax.f32 %v1153_v36, 0.0 }
 0x21c   : > { %v1232_v51 = vmax.f32 %v1155_v15, 0.0 }
 0x21d   : > { %v1261_v18 = vpack.c.bf16 %v1231_v16, %v1229_v50 }
 0x21e   : > { %v1262_v19 = vpack.c.bf16 %v1232_v51, %v1230_v17  ;;  %v1158_v52 = vpop.f32.mrb[8].mxu1 }
 0x21f   : > { %v1159_v37 = vadd.f32 %v1158_v52, %v2644_v33  ;;  %v1160_v20 = vpop.f32.mrb[9].mxu1 }
 0x220   : > { %v1161_v38 = vadd.f32 %v1160_v20, %v2647_v53  ;;  %v1162_v21 = vpop.f32.mrb[10].mxu1  ;;  %1523 = vmatprep.mubr.bf16.mxu0 %v1262_v19 }
 0x221   : > { %v1163_v22 = vadd.f32 %v1162_v21, %v2644_v33  ;;  %v1164_v54 = vpop.f32.mrb[11].mxu1  ;;  %1524 = vmatmul.mubr.bf16.gmra.mrb[44].mxu0 %v1261_v18  ;;  %v1233_v55 = vmax.f32 %v1159_v37, 0.0 }
 0x222   : > { %v1165_v39 = vadd.f32 %v1164_v54, %v2647_v53  ;;  %v1234_v24 = vmax.f32 %v1161_v38, 0.0 }
 0x223   : > { %v1235_v23 = vmax.f32 %v1163_v22, 0.0 }
 0x224   : > { %v1236_v57 = vmax.f32 %v1165_v39, 0.0 }
 0x225   : > { %v1263_v40 = vpack.c.bf16 %v1235_v23, %v1233_v55 }
 0x226   : > { %v1264_v25 = vpack.c.bf16 %v1236_v57, %v1234_v24  ;;  %v1168_v58 = vpop.f32.mrb[12].mxu1 }
 0x227   : > { %v1169_v26 = vadd.f32 %v1168_v58, %v2644_v33  ;;  %v1170_v4 = vpop.f32.mrb[13].mxu1 }
 0x228   : > { %v1171_v27 = vadd.f32 %v1170_v4, %v2647_v53  ;;  %v1172_v28 = vpop.f32.mrb[14].mxu1  ;;  %1533 = vmatprep.mubr.bf16.mxu0 %v1264_v25 }
 0x229   : > { %v1173_v41 = vadd.f32 %v1172_v28, %v2644_v33  ;;  %v1174_v1 = vpop.f32.mrb[15].mxu1  ;;  %1534 = vmatmul.mubr.bf16.gmra.mrb[48].mxu0 %v1263_v40  ;;  %v1237_v3 = vmax.f32 %v1169_v26, 0.0 }
 0x22a   : > { %v1175_v29 = vadd.f32 %v1174_v1, %v2647_v53  ;;  %v1238_v30 = vmax.f32 %v1171_v27, 0.0 }
 0x22b   : > { %v1239_v42 = vmax.f32 %v1173_v41, 0.0 }
 0x22c   : > { %v1240_v31 = vmax.f32 %v1175_v29, 0.0 }
 0x22d   : > { %v1265_v43 = vpack.c.bf16 %v1239_v42, %v1237_v3 }
 0x22e   : > { %v1266_v59 = vpack.c.bf16 %v1240_v31, %v1238_v30  ;;  %v1178_v60 = vpop.f32.mrb[16].mxu1 }
 0x22f   : > { %v1179_v5 = vadd.f32 %v1178_v60, %v2644_v33  ;;  %v1180_v6 = vpop.f32.mrb[17].mxu1 }
 0x230   : > { %v1181_v7 = vadd.f32 %v1180_v6, %v2647_v53  ;;  %v1182_v44 = vpop.f32.mrb[18].mxu1  ;;  %1543 = vmatprep.mubr.bf16.mxu1 %v1266_v59 }
 0x231   : > { %v1183_v56 = vadd.f32 %v1182_v44, %v2644_v33  ;;  %v1184_v62 = vpop.f32.mrb[19].mxu1  ;;  %1544 = vmatmul.mubr.bf16.vlgmr.msra.gmra.mrb[36].mxu1 %v1265_v43  ;;  %v1241_v2 = vmax.f32 %v1179_v5, 0.0 }
 0x232   : > { %v1185_v63 = vadd.f32 %v1184_v62, %v2647_v53  ;;  %v1242_v45 = vmax.f32 %v1181_v7, 0.0  ;;  %v1309_v62 = vld [vmem:[%s2820_s8] sm:$0x3] }
 0x233   : > { %v1243_v8 = vmax.f32 %v1183_v56, 0.0 }
 0x234   : > { %v1244_v9 = vmax.f32 %v1185_v63, 0.0  ;;  %v2687_v63 = vrot.slane %v1309_v62, %v2532_v61 }
 0x235   : > { %v1267_v46 = vpack.c.bf16 %v1243_v8, %v1241_v2 }
 0x236   : > { %v1268_v32 = vpack.c.bf16 %v1244_v9, %v1242_v45  ;;  %v1188_v10 = vpop.f32.mrb[20].mxu1 }
 0x237   : > { %v1189_v47 = vadd.f32 %v1188_v10, %v2644_v33  ;;  %v1190_v34 = vpop.f32.mrb[21].mxu1 }
 0x238   : > { %v1191_v11 = vadd.f32 %v1190_v34, %v2647_v53  ;;  %v1192_v48 = vpop.f32.mrb[22].mxu1  ;;  %1553 = vmatprep.mubr.bf16.mxu1 %v1268_v32 }
 0x239   : > { %v1193_v12 = vadd.f32 %v1192_v48, %v2644_v33  ;;  %v1194_v35 = vpop.f32.mrb[23].mxu1  ;;  %1554 = vmatmul.mubr.bf16.gmra.mrb[40].mxu1 %v1267_v46  ;;  %v1245_v14 = vmax.f32 %v1189_v47, 0.0 }
 0x23a   : > { %v1195_v13 = vadd.f32 %v1194_v35, %v2647_v53  ;;  %v1246_v49 = vmax.f32 %v1191_v11, 0.0 }
 0x23b   : > { %v1247_v36 = vmax.f32 %v1193_v12, 0.0 }
 0x23c   : > { %v1248_v15 = vmax.f32 %v1195_v13, 0.0 }
 0x23d   : > { %v1269_v50 = vpack.c.bf16 %v1247_v36, %v1245_v14 }
 0x23e   : > { %v1270_v16 = vpack.c.bf16 %v1248_v15, %v1246_v49  ;;  %v1198_v17 = vpop.f32.mrb[24].mxu1 }
 0x23f   : > { %v1199_v51 = vadd.f32 %v1198_v17, %v2644_v33  ;;  %v1200_v18 = vpop.f32.mrb[25].mxu1 }
 0x240   : > { %v1201_v19 = vadd.f32 %v1200_v18, %v2647_v53  ;;  %v1202_v52 = vpop.f32.mrb[26].mxu1  ;;  %1563 = vmatprep.mubr.bf16.mxu1 %v1270_v16 }
 0x241   : > { %v1203_v37 = vadd.f32 %v1202_v52, %v2644_v33  ;;  %v1204_v20 = vpop.f32.mrb[27].mxu1  ;;  %1564 = vmatmul.mubr.bf16.gmra.mrb[44].mxu1 %v1269_v50  ;;  %v1249_v21 = vmax.f32 %v1199_v51, 0.0 }
 0x242   : > { %v1205_v38 = vadd.f32 %v1204_v20, %v2647_v53  ;;  %v1250_v54 = vmax.f32 %v1201_v19, 0.0 }
 0x243   : > { %v1251_v22 = vmax.f32 %v1203_v37, 0.0 }
 0x244   : > { %v1252_v39 = vmax.f32 %v1205_v38, 0.0 }
 0x245   : > { %v1271_v55 = vpack.c.bf16 %v1251_v22, %v1249_v21 }
 0x246   : > { %v1272_v23 = vpack.c.bf16 %v1252_v39, %v1250_v54  ;;  %v1208_v24 = vpop.f32.mrb[28].mxu1 }
 0x247   : > { %v1209_v57 = vadd.f32 %v1208_v24, %v2644_v33  ;;  %v1210_v40 = vpop.f32.mrb[29].mxu1 }
 0x248   : > { %v1211_v25 = vadd.f32 %v1210_v40, %v2647_v53  ;;  %v1212_v58 = vpop.f32.mrb[30].mxu1  ;;  %1573 = vmatprep.mubr.bf16.mxu1 %v1272_v23 }
 0x249   : > { %v1213_v26 = vadd.f32 %v1212_v58, %v2644_v33  ;;  %v1214_v4 = vpop.f32.mrb[31].mxu1  ;;  %1574 = vmatmul.mubr.bf16.gmra.mrb[48].mxu1 %v1271_v55  ;;  %v1253_v28 = vmax.f32 %v1209_v57, 0.0 }
 0x24a   : > { %v1215_v27 = vadd.f32 %v1214_v4, %v2647_v53  ;;  %v1254_v1 = vmax.f32 %v1211_v25, 0.0 }
 0x24b   : > { %v1255_v41 = vmax.f32 %v1213_v26, 0.0 }
 0x24c   : > { %v1256_v29 = vmax.f32 %v1215_v27, 0.0 }
 0x24d   : > { %v1273_v3 = vpack.c.bf16 %v1255_v41, %v1253_v28 }
 0x24e   : > { %v1274_v42 = vpack.c.bf16 %v1256_v29, %v1254_v1  ;;  %v1218_v30 = vpop.f32.mrb[32].mxu1 }
 0x24f   : > { %v1219_v31 = vadd.f32 %v1218_v30, %v2644_v33  ;;  %v1220_v43 = vpop.f32.mrb[33].mxu1  ;;  %v2690_v33 = vrot.slane %v1309_v62, %v2537_v0 }
 0x250   : > { %v1221_v59 = vadd.f32 %v1220_v43, %v2647_v53  ;;  %v1222_v60 = vpop.f32.mrb[34].mxu1  ;;  %1583 = vmatprep.mubr.bf16.mxu1 %v1274_v42  ;;  %v1636_v53 = vld [vmem:[%s2821_s9] sm:$0x3] }
 0x251   : > { %v1223_v5 = vpop.f32.mrb[35].mxu1  ;;  %1584 = vmatmul.mubr.bf16.gmra.mrb[52].mxu1 %v1273_v3  ;;  %v1257_v7 = vmax.f32 %v1219_v31, 0.0  ;;  %v2697_v9 = vrot.slane %v1636_v53, %v2532_v61  ;;  %v2701_v10 = vrot.slane %v1636_v53, %v2537_v0 }
 0x252   : > { %v1258_v6 = vmax.f32 %v1221_v59, 0.0 }
 0x253   : > { %v1275_v56 = vpack.c.bf16 %v1257_v7, %v1257_v7 }
 0x254   : > { %v1276_v44 = vpack.c.bf16 %v1258_v6, %v1258_v6 }
 0x256   : > { %1593 = vmatprep.mubr.bf16.mxu1 %v1276_v44 }
 0x259   : > { %1594 = vmatmul.mubr.bf16.gmra.mrb[56].mxu1 %v1275_v56 }
 0x2ec   : > { %v1515_v2 = vpop.f32.mrb[40].mxu0 }
 0x2ed   : > { %v1516_v8 = vadd.f32 %v1515_v2, %v2687_v63  ;;  %v1517_v45 = vpop.f32.mrb[41].mxu0 }
 0x2ee   : > { %v1518_v46 = vadd.f32 %v1517_v45, %v2690_v33  ;;  %v1519_v32 = vpop.f32.mrb[42].mxu0 }
 0x2ef   : > { %v1602_v47 = vmax.f32 %v1516_v8, 0.0  ;;  %v1520_v34 = vadd.f32 %v1519_v32, %v2687_v63  ;;  %v1521_v11 = vpop.f32.mrb[43].mxu0 }
 0x2f0   : > { %v1603_v48 = vmax.f32 %v1518_v46, 0.0  ;;  %v1522_v12 = vadd.f32 %v1521_v11, %v2690_v33 }
 0x2f1   : > { %v1604_v35 = vmax.f32 %v1520_v34, 0.0  ;;  %v1648_v13 = vmul.f32 %v2697_v9, %v1602_v47 }
 0x2f2   : > { %v1605_v14 = vmax.f32 %v1522_v12, 0.0  ;;  %v1649_v61 = vmul.f32 %v2701_v10, %v1603_v48 }
 0x2f3   : > { %v1650_v36 = vmul.f32 %v2697_v9, %v1604_v35 }
 0x2f4   : > { %v1651_v49 = vmul.f32 %v2701_v10, %v1605_v14  ;;  %v1525_v15 = vpop.f32.mrb[44].mxu0  ;;  %v1682_v0 = vadd.f32 %v1649_v61, %v1648_v13 }
 0x2f5   : > { %v1526_v50 = vadd.f32 %v1525_v15, %v2687_v63  ;;  %v1527_v16 = vpop.f32.mrb[45].mxu0 }
 0x2f6   : > { %v1528_v17 = vadd.f32 %v1527_v16, %v2690_v33  ;;  %v1529_v51 = vpop.f32.mrb[46].mxu0  ;;  %1683 = vadd.xlane.f32.xlu0 %v1682_v0  ;;  %v1685_v18 = vadd.f32 %v1651_v49, %v1650_v36 }
 0x2f7   : > { %v1606_v19 = vmax.f32 %v1526_v50, 0.0  ;;  %v1530_v52 = vadd.f32 %v1529_v51, %v2687_v63  ;;  %v1531_v37 = vpop.f32.mrb[47].mxu0 }
 0x2f8   : > { %v1607_v20 = vmax.f32 %v1528_v17, 0.0  ;;  %v1532_v38 = vadd.f32 %v1531_v37, %v2690_v33 }
 0x2f9   : > { %v1608_v21 = vmax.f32 %v1530_v52, 0.0  ;;  %v1652_v22 = vmul.f32 %v2697_v9, %v1606_v19 }
 0x2fa   : > { %v1609_v54 = vmax.f32 %v1532_v38, 0.0  ;;  %1686 = vadd.xlane.f32.xlu0 %v1685_v18  ;;  %v1653_v39 = vmul.f32 %v2701_v10, %v1607_v20 }
 0x2fb   : > { %v1654_v55 = vmul.f32 %v2697_v9, %v1608_v21 }
 0x2fc   : > { %v1655_v23 = vmul.f32 %v2701_v10, %v1609_v54  ;;  %v1535_v24 = vpop.f32.mrb[48].mxu0  ;;  %v1688_v57 = vadd.f32 %v1653_v39, %v1652_v22 }
 0x2fd   : > { %v1536_v40 = vadd.f32 %v1535_v24, %v2687_v63  ;;  %v1537_v25 = vpop.f32.mrb[49].mxu0 }
 0x2fe   : > { %v1538_v58 = vadd.f32 %v1537_v25, %v2690_v33  ;;  %v1539_v26 = vpop.f32.mrb[50].mxu0  ;;  %1689 = vadd.xlane.f32.xlu1 %v1688_v57  ;;  %v1691_v4 = vadd.f32 %v1655_v23, %v1654_v55 }
 0x2ff   : > { %v1610_v27 = vmax.f32 %v1536_v40, 0.0  ;;  %v1540_v28 = vadd.f32 %v1539_v26, %v2687_v63  ;;  %v1541_v41 = vpop.f32.mrb[51].mxu0 }
 0x300   : > { %v1611_v1 = vmax.f32 %v1538_v58, 0.0  ;;  %v1542_v29 = vadd.f32 %v1541_v41, %v2690_v33 }
 0x301   : > { %v1656_v3 = vmul.f32 %v2697_v9, %v1610_v27  ;;  %v1612_v42 = vmax.f32 %v1540_v28, 0.0 }
 0x302   : > { %v1657_v30 = vmul.f32 %v2701_v10, %v1611_v1  ;;  %v1613_v31 = vmax.f32 %v1542_v29, 0.0  ;;  %1692 = vadd.xlane.f32.xlu1 %v1691_v4 }
 0x303   : > { %v1658_v43 = vmul.f32 %v2697_v9, %v1612_v42 }
 0x304   : > { %v1659_v59 = vmul.f32 %v2701_v10, %v1613_v31  ;;  %v1545_v60 = vpop.f32.mrb[36].mxu1  ;;  %v1694_v5 = vadd.f32 %v1657_v30, %v1656_v3 }
 0x305   : > { %v1546_v6 = vadd.f32 %v1545_v60, %v2687_v63  ;;  %v1547_v7 = vpop.f32.mrb[37].mxu1 }
 0x306   : > { %v1548_v44 = vadd.f32 %v1547_v7, %v2690_v33  ;;  %1695 = vadd.xlane.f32.xlu0 %v1694_v5  ;;  %v1549_v56 = vpop.f32.mrb[38].mxu1  ;;  %v1697_v62 = vadd.f32 %v1659_v59, %v1658_v43 }
 0x307   : > { %v1614_v53 = vmax.f32 %v1546_v6, 0.0  ;;  %v1550_v2 = vadd.f32 %v1549_v56, %v2687_v63  ;;  %v1551_v8 = vpop.f32.mrb[39].mxu1 }
 0x308   : > { %v1615_v45 = vmax.f32 %v1548_v44, 0.0  ;;  %v1552_v46 = vadd.f32 %v1551_v8, %v2690_v33  ;;  %1698 = vadd.xlane.f32.xlu1 %v1697_v62 }
 0x309   : > { %v1660_v32 = vmul.f32 %v2697_v9, %v1614_v53  ;;  %v1616_v47 = vmax.f32 %v1550_v2, 0.0 }
 0x30a   : > { %v1661_v34 = vmul.f32 %v2701_v10, %v1615_v45  ;;  %v1617_v11 = vmax.f32 %v1552_v46, 0.0 }
 0x30b   : > { %v1662_v48 = vmul.f32 %v2697_v9, %v1616_v47 }
 0x30c   : > { %v1663_v12 = vmul.f32 %v2701_v10, %v1617_v11  ;;  %v1555_v35 = vpop.f32.mrb[40].mxu1  ;;  %v1700_v13 = vadd.f32 %v1661_v34, %v1660_v32 }
 0x30d   : > { %v1556_v14 = vadd.f32 %v1555_v35, %v2687_v63  ;;  %v1557_v61 = vpop.f32.mrb[41].mxu1 }
 0x30e   : > { %v1558_v36 = vadd.f32 %v1557_v61, %v2690_v33  ;;  %v1559_v49 = vpop.f32.mrb[42].mxu1  ;;  %1701 = vadd.xlane.f32.xlu0 %v1700_v13  ;;  %v1703_v15 = vadd.f32 %v1663_v12, %v1662_v48 }
 0x30f   : > { %v1618_v0 = vmax.f32 %v1556_v14, 0.0  ;;  %v1560_v50 = vadd.f32 %v1559_v49, %v2687_v63  ;;  %v1561_v16 = vpop.f32.mrb[43].mxu1 }
 0x310   : > { %v1619_v17 = vmax.f32 %v1558_v36, 0.0  ;;  %v1562_v51 = vadd.f32 %v1561_v16, %v2690_v33  ;;  %1704 = vadd.xlane.f32.xlu1 %v1703_v15 }
 0x311   : > { %v1664_v18 = vmul.f32 %v2697_v9, %v1618_v0  ;;  %v1620_v19 = vmax.f32 %v1560_v50, 0.0 }
 0x312   : > { %v1665_v52 = vmul.f32 %v2701_v10, %v1619_v17  ;;  %v1621_v37 = vmax.f32 %v1562_v51, 0.0 }
 0x313   : > { %v1666_v20 = vmul.f32 %v2697_v9, %v1620_v19 }
 0x314   : > { %v1667_v38 = vmul.f32 %v2701_v10, %v1621_v37  ;;  %v1565_v21 = vpop.f32.mrb[44].mxu1  ;;  %v1706_v22 = vadd.f32 %v1665_v52, %v1664_v18 }
 0x315   : > { %v1566_v54 = vadd.f32 %v1565_v21, %v2687_v63  ;;  %v1567_v39 = vpop.f32.mrb[45].mxu1 }
 0x316   : > { %v1568_v55 = vadd.f32 %v1567_v39, %v2690_v33  ;;  %v1569_v23 = vpop.f32.mrb[46].mxu1  ;;  %1707 = vadd.xlane.f32.xlu0 %v1706_v22  ;;  %v1709_v24 = vadd.f32 %v1667_v38, %v1666_v20 }
 0x317   : > { %v1622_v57 = vmax.f32 %v1566_v54, 0.0  ;;  %v1570_v40 = vadd.f32 %v1569_v23, %v2687_v63  ;;  %v1571_v25 = vpop.f32.mrb[47].mxu1 }
 0x318   : > { %v1623_v58 = vmax.f32 %v1568_v55, 0.0  ;;  %v1572_v26 = vadd.f32 %v1571_v25, %v2690_v33  ;;  %1710 = vadd.xlane.f32.xlu1 %v1709_v24 }
 0x319   : > { %v1668_v4 = vmul.f32 %v2697_v9, %v1622_v57  ;;  %v1624_v27 = vmax.f32 %v1570_v40, 0.0  ;;  %v1937_v57 = vld [vmem:[#allocation2] ss:$0 sm:$0xff] }
 0x31a   : > { %v1669_v28 = vmul.f32 %v2701_v10, %v1623_v58  ;;  %v1625_v41 = vmax.f32 %v1572_v26, 0.0 }
 0x31b   : > { %v1670_v1 = vmul.f32 %v2697_v9, %v1624_v27 }
 0x31c   : > { %v1671_v29 = vmul.f32 %v2701_v10, %v1625_v41  ;;  %v1575_v3 = vpop.f32.mrb[48].mxu1  ;;  %v1712_v42 = vadd.f32 %v1669_v28, %v1668_v4 }
 0x31d   : > { %v1576_v30 = vadd.f32 %v1575_v3, %v2687_v63  ;;  %v1577_v31 = vpop.f32.mrb[49].mxu1 }
 0x31e   : > { %v1578_v43 = vadd.f32 %v1577_v31, %v2690_v33  ;;  %v1579_v59 = vpop.f32.mrb[50].mxu1  ;;  %1713 = vadd.xlane.f32.xlu0 %v1712_v42  ;;  %v1715_v60 = vadd.f32 %v1671_v29, %v1670_v1 }
 0x31f   : > { %v1626_v5 = vmax.f32 %v1576_v30, 0.0  ;;  %v1580_v6 = vadd.f32 %v1579_v59, %v2687_v63  ;;  %v1581_v7 = vpop.f32.mrb[51].mxu1 }
 0x320   : > { %v1627_v44 = vmax.f32 %v1578_v43, 0.0  ;;  %v1582_v56 = vadd.f32 %v1581_v7, %v2690_v33  ;;  %1716 = vadd.xlane.f32.xlu1 %v1715_v60 }
 0x321   : > { %v1672_v62 = vmul.f32 %v2697_v9, %v1626_v5  ;;  %v1628_v53 = vmax.f32 %v1580_v6, 0.0 }
 0x322   : > { %v1673_v2 = vmul.f32 %v2701_v10, %v1627_v44  ;;  %v1629_v8 = vmax.f32 %v1582_v56, 0.0 }
 0x323   : > { %v1674_v45 = vmul.f32 %v2697_v9, %v1628_v53 }
 0x324   : > { %v1675_v46 = vmul.f32 %v2701_v10, %v1629_v8  ;;  %v1585_v32 = vpop.f32.mrb[52].mxu1  ;;  %v1718_v47 = vadd.f32 %v1673_v2, %v1672_v62 }
 0x325   : > { %v1586_v34 = vadd.f32 %v1585_v32, %v2687_v63  ;;  %v1587_v11 = vpop.f32.mrb[53].mxu1 }
 0x326   : > { %v1588_v48 = vadd.f32 %v1587_v11, %v2690_v33  ;;  %v1589_v12 = vpop.f32.mrb[54].mxu1  ;;  %1719 = vadd.xlane.f32.xlu0 %v1718_v47  ;;  %v1721_v35 = vadd.f32 %v1675_v46, %v1674_v45 }
 0x327   : > { %v1630_v13 = vmax.f32 %v1586_v34, 0.0  ;;  %v1590_v14 = vadd.f32 %v1589_v12, %v2687_v63  ;;  %v1591_v61 = vpop.f32.mrb[55].mxu1 }
 0x328   : > { %v1631_v36 = vmax.f32 %v1588_v48, 0.0  ;;  %v1592_v49 = vadd.f32 %v1591_v61, %v2690_v33  ;;  %1722 = vadd.xlane.f32.xlu1 %v1721_v35 }
 0x329   : > { %v1676_v15 = vmul.f32 %v2697_v9, %v1630_v13  ;;  %v1632_v0 = vmax.f32 %v1590_v14, 0.0 }
 0x32a   : > { %v1677_v50 = vmul.f32 %v2701_v10, %v1631_v36  ;;  %v1633_v16 = vmax.f32 %v1592_v49, 0.0 }
 0x32b   : > { %v1678_v17 = vmul.f32 %v2697_v9, %v1632_v0 }
 0x32c   : > { %v1679_v51 = vmul.f32 %v2701_v10, %v1633_v16  ;;  %v1595_v18 = vpop.f32.mrb[56].mxu1  ;;  %v1724_v19 = vadd.f32 %v1677_v50, %v1676_v15 }
 0x32d   : > { %v1596_v52 = vadd.f32 %v1595_v18, %v2687_v63  ;;  %v1597_v37 = vpop.f32.mrb[57].mxu1 }
 0x32e   : > { %v1598_v20 = vadd.f32 %v1597_v37, %v2690_v33  ;;  %1725 = vadd.xlane.f32.xlu0 %v1724_v19  ;;  %v1599_v38 = vpop.f32.mrb[58].mxu1  ;;  %v1727_v21 = vadd.f32 %v1679_v51, %v1678_v17 }
 0x32f   : > { %v1634_v22 = vmax.f32 %v1596_v52, 0.0  ;;  %v1600_v54 = vpop.f32.mrb[59].mxu1 }
 0x330   : > { %v1635_v39 = vmax.f32 %v1598_v20, 0.0  ;;  %1728 = vadd.xlane.f32.xlu1 %v1727_v21 }
 0x331   : > { %v1680_v55 = vmul.f32 %v2697_v9, %v1634_v22 }
 0x332   : > { %v1681_v23 = vmul.f32 %v2701_v10, %v1635_v39 }
 0x334   : > { %v1730_v24 = vadd.f32 %v1681_v23, %v1680_v55 }
 0x336   : > { %1731 = vadd.xlane.f32.xlu0 %v1730_v24 }
 0x383   : > { %v1684_v63 = vpop.xlane.xlu0 %1683 }
 0x384   : > { %v1740_v33 = vadd.f32 %v1937_v57, %v1684_v63 }
 0x386   : > { %1758 = vst.msk [vmem:[%s2773_s29] sm:$0xff] %vm1757_vm5, %v1740_v33 }
 0x387   : > { %v1687_v9 = vpop.xlane.xlu0 %1686 }
 0x388   : > { %v1741_v10 = vadd.f32 %v1937_v57, %v1687_v9 }
 0x38a   : > { %1759 = vst.msk [vmem:[%s2773_s29 + $0x8] sm:$0xff] %vm1757_vm5, %v1741_v10 }
 0x38b   : > { %v1690_v40 = vpop.xlane.xlu1 %1689 }
 0x38c   : > { %v1742_v25 = vadd.f32 %v1937_v57, %v1690_v40 }
 0x38e   : > { %1760 = vst.msk [vmem:[%s2773_s29 + $0x10] sm:$0xff] %vm1757_vm5, %v1742_v25 }
 0x38f   : > { %v1693_v58 = vpop.xlane.xlu1 %1692 }
 0x390   : > { %v1743_v26 = vadd.f32 %v1937_v57, %v1693_v58 }
 0x392   : > { %1761 = vst.msk [vmem:[%s2773_s29 + $0x18] sm:$0xff] %vm1757_vm5, %v1743_v26 }
 0x393   : > { %v1696_v4 = vpop.xlane.xlu0 %1695 }
 0x394   : > { %v1744_v27 = vadd.f32 %v1937_v57, %v1696_v4 }
 0x395   : > { %v1699_v28 = vpop.xlane.xlu1 %1698 }
 0x396   : > { %1762 = vst.msk [vmem:[%s2773_s29 + $0x20] sm:$0xff] %vm1757_vm5, %v1744_v27  ;;  %v1745_v41 = vadd.f32 %v1937_v57, %v1699_v28 }
 0x398   : > { %1763 = vst.msk [vmem:[%s2773_s29 + $0x28] sm:$0xff] %vm1757_vm5, %v1745_v41 }
 0x39b   : > { %v1702_v1 = vpop.xlane.xlu0 %1701 }
 0x39c   : > { %v1746_v29 = vadd.f32 %v1937_v57, %v1702_v1 }
 0x39d   : > { %v1705_v3 = vpop.xlane.xlu1 %1704 }
 0x39e   : > { %1764 = vst.msk [vmem:[%s2773_s29 + $0x30] sm:$0xff] %vm1757_vm5, %v1746_v29  ;;  %v1747_v42 = vadd.f32 %v1937_v57, %v1705_v3 }
 0x3a0   : > { %1765 = vst.msk [vmem:[%s2773_s29 + $0x38] sm:$0xff] %vm1757_vm5, %v1747_v42 }
 0x3a3   : > { %v1708_v30 = vpop.xlane.xlu0 %1707 }
 0x3a4   : > { %v1748_v31 = vadd.f32 %v1937_v57, %v1708_v30 }
 0x3a5   : > { %v1711_v43 = vpop.xlane.xlu1 %1710 }
 0x3a6   : > { %1766 = vst.msk [vmem:[%s2773_s29 + $0x40] sm:$0xff] %vm1757_vm5, %v1748_v31  ;;  %v1749_v59 = vadd.f32 %v1937_v57, %v1711_v43 }
 0x3a8   : > { %1767 = vst.msk [vmem:[%s2773_s29 + $0x48] sm:$0xff] %vm1757_vm5, %v1749_v59 }
 0x3ab   : > { %v1714_v60 = vpop.xlane.xlu0 %1713 }
 0x3ac   : > { %v1750_v5 = vadd.f32 %v1937_v57, %v1714_v60 }
 0x3ad   : > { %v1717_v6 = vpop.xlane.xlu1 %1716 }
 0x3ae   : > { %1768 = vst.msk [vmem:[%s2773_s29 + $0x50] sm:$0xff] %vm1757_vm5, %v1750_v5  ;;  %v1751_v7 = vadd.f32 %v1937_v57, %v1717_v6 }
 0x3b0   : > { %1769 = vst.msk [vmem:[%s2773_s29 + $0x58] sm:$0xff] %vm1757_vm5, %v1751_v7 }
 0x3b3   : > { %v1720_v44 = vpop.xlane.xlu0 %1719 }
 0x3b4   : > { %v1752_v56 = vadd.f32 %v1937_v57, %v1720_v44 }
 0x3b5   : > { %v1723_v62 = vpop.xlane.xlu1 %1722 }
 0x3b6   : > { %1770 = vst.msk [vmem:[%s2773_s29 + $0x60] sm:$0xff] %vm1757_vm5, %v1752_v56  ;;  %v1753_v53 = vadd.f32 %v1937_v57, %v1723_v62 }
 0x3b8   : > { %1771 = vst.msk [vmem:[%s2773_s29 + $0x68] sm:$0xff] %vm1757_vm5, %v1753_v53 }
 0x3bb   : > { %v1726_v2 = vpop.xlane.xlu0 %1725 }
 0x3bc   : > { %v1754_v8 = vadd.f32 %v1937_v57, %v1726_v2 }
 0x3bd   : > { %v1729_v45 = vpop.xlane.xlu1 %1728 }
 0x3be   : > { %1772 = vst.msk [vmem:[%s2773_s29 + $0x70] sm:$0xff] %vm1757_vm5, %v1754_v8  ;;  %v1755_v46 = vadd.f32 %v1937_v57, %v1729_v45 }
 0x3c0   : > { %1773 = vst.msk [vmem:[%s2773_s29 + $0x78] sm:$0xff] %vm1757_vm5, %v1755_v46 }
 0x3c3   : > { %v1732_v32 = vpop.xlane.xlu0 %1731 }
 0x3c4   : > { %v1756_v47 = vadd.f32 %v1937_v57, %v1732_v32 }
 0x3c6   : > { %1774 = vst.msk [vmem:[%s2773_s29 + $0x80] sm:$0xff] %vm1757_vm5, %v1756_v47 }
 0x3c7 PF: > { %s23_s19 = sadd.s32 1, %s2119_s19  }
 0x3c8   : > { %p20_p4 = scmp.ge.s32.totalorder %s23_s19, 4  }
 0x3ca   :  { %22 = sbr.rel (!%p20_p4) target bundleno = 3 (0x3), region = 97 }

</bundles_post_ra>
